<compile_context>
chip_gen: v7x
topology: tpu7x:2x2x1
jax: 0.10.0
libtpu: 0.0.40
codegen_flags: <defaults>
</compile_context>

<pallas_src>
import functools

import jax
import jax.numpy as jnp
from jax import lax
from jax.experimental import pallas as pl
from jax.experimental.pallas import tpu as pltpu


def _round_up(x, m):
    return ((x + m - 1) // m) * m


# ---------------------------------------------------------------------------
# Pass 1: running max of squared pairwise distances of X  (-> big = max(XX)+1)
# ---------------------------------------------------------------------------
def _max_d2_kernel(xa_ref, xb_ref, mx_ref):
    @pl.when(jnp.logical_and(pl.program_id(0) == 0, pl.program_id(1) == 0))
    def _init():
        mx_ref[...] = jnp.zeros_like(mx_ref)

    # Augmented features: the contraction directly yields ||xi||^2 + ||xj||^2
    # - 2<xi, xj>; no transpose of the RHS is ever materialised.
    d2 = lax.dot_general(
        xa_ref[...], xb_ref[...],
        dimension_numbers=(((1,), (1,)), ((), ())),
        preferred_element_type=jnp.float32)
    mx_ref[...] = jnp.maximum(mx_ref[...], jnp.max(d2))


# ---------------------------------------------------------------------------
# Pass 2: lane-dense (2*n_pad, 2*n_pad) core of the relative-cross matrix.
#   quadrants:  [ XX                | triu-masked XX ]
#               [ tril-masked XX    | min(XX, YY)    ]
#   (masked entries are written as `big`, matching the reference's
#    isfinite -> big substitution.)
# ---------------------------------------------------------------------------
def _core_kernel(big_ref, xa_ref, xb_ref, ya_ref, yb_ref, out_ref, *, nb, tile):
    i = pl.program_id(0)
    j = pl.program_id(1)
    big = big_ref[0, 0]

    d2x = lax.dot_general(
        xa_ref[...], xb_ref[...],
        dimension_numbers=(((1,), (1,)), ((), ())),
        preferred_element_type=jnp.float32)
    xx = jnp.sqrt(jnp.maximum(d2x, 0.0))

    top = i < nb
    left = j < nb

    @pl.when(jnp.logical_and(top, left))                        # TL: XX
    def _tl():
        out_ref[...] = xx

    @pl.when(jnp.logical_and(top, jnp.logical_not(left)))       # TR: r <= c keeps XX
    def _tr():
        r = lax.broadcasted_iota(jnp.int32, (tile, tile), 0) + i * tile
        c = lax.broadcasted_iota(jnp.int32, (tile, tile), 1) + (j - nb) * tile
        out_ref[...] = jnp.where(r <= c, xx, big)

    @pl.when(jnp.logical_and(jnp.logical_not(top), left))       # BL: r >= c keeps XX
    def _bl():
        r = lax.broadcasted_iota(jnp.int32, (tile, tile), 0) + (i - nb) * tile
        c = lax.broadcasted_iota(jnp.int32, (tile, tile), 1) + j * tile
        out_ref[...] = jnp.where(r >= c, xx, big)

    @pl.when(jnp.logical_and(jnp.logical_not(top), jnp.logical_not(left)))  # BR
    def _br():
        d2y = lax.dot_general(
            ya_ref[...], yb_ref[...],
            dimension_numbers=(((1,), (1,)), ((), ())),
            preferred_element_type=jnp.float32)
        # min(sqrt(a), sqrt(b)) == sqrt(min(a, b))  (sqrt is monotone)
        out_ref[...] = jnp.sqrt(jnp.maximum(jnp.minimum(d2x, d2y), 0.0))


# ---------------------------------------------------------------------------
# Wrapper-side padding / feature augmentation (layout plumbing, not compute).
# ---------------------------------------------------------------------------
def _augment(X, n_pad, d_aug):
    """Pad rows with copies of row 0 and build the two augmented operands."""
    n, d = X.shape
    Xp = jnp.concatenate(
        [X, jnp.broadcast_to(X[0:1], (n_pad - n, d))], axis=0)
    sq = jnp.sum(Xp * Xp, axis=1, keepdims=True)                   # (n_pad, 1)
    ones = jnp.ones((n_pad, 1), jnp.float32)
    zpad = jnp.zeros((n_pad, d_aug - d - 2), jnp.float32)
    A = jnp.concatenate([-2.0 * Xp, sq, ones, zpad], axis=1)       # (n_pad, d_aug)
    B = jnp.concatenate([Xp, ones, sq, zpad], axis=1)              # (n_pad, d_aug)
    return A, B


def _build_core(X, Y):
    """Returns (core, big, n_pad): core is the lane-dense padded 2n_pad x 2n_pad slab."""
    X = X.astype(jnp.float32)
    Y = Y.astype(jnp.float32)
    n, d = X.shape
    n_pad = max(_round_up(n, 128), 128)
    d_aug = max(_round_up(d + 2, 128), 128)
    tile = 256 if n_pad % 256 == 0 else 128
    nb = n_pad // tile

    XA, XB = _augment(X, n_pad, d_aug)
    YA, YB = _augment(Y, n_pad, d_aug)

    # --- pass 1: max squared distance over XX (tiled grid reduction) -------
    maxbuf = pl.pallas_call(
        _max_d2_kernel,
        out_shape=jax.ShapeDtypeStruct((8, 128), jnp.float32),
        grid=(nb, nb),
        in_specs=[
            pl.BlockSpec((tile, d_aug), lambda i, j: (i, 0)),
            pl.BlockSpec((tile, d_aug), lambda i, j: (j, 0)),
        ],
        out_specs=pl.BlockSpec((8, 128), lambda i, j: (0, 0)),
        compiler_params=pltpu.CompilerParams(
            dimension_semantics=("arbitrary", "arbitrary")),
    )(XA, XB)
    big = jnp.sqrt(jnp.maximum(maxbuf[0, 0], 0.0)) + 1.0           # == max(XX) + 1

    # --- pass 2: build the core on a 2-D parallel grid ----------------------
    big_arr = jnp.reshape(big, (1, 1))
    kernel = functools.partial(_core_kernel, nb=nb, tile=tile)
    core = pl.pallas_call(
        kernel,
        out_shape=jax.ShapeDtypeStruct((2 * n_pad, 2 * n_pad), jnp.float32),
        grid=(2 * nb, 2 * nb),
        in_specs=[
            pl.BlockSpec((1, 1), lambda i, j: (0, 0)),              # big
            pl.BlockSpec((tile, d_aug), lambda i, j: (i % nb, 0)),  # XA (row block)
            pl.BlockSpec((tile, d_aug), lambda i, j: (j % nb, 0)),  # XB (col block)
            pl.BlockSpec((tile, d_aug), lambda i, j: (i % nb, 0)),  # YA (row block)
            pl.BlockSpec((tile, d_aug), lambda i, j: (j % nb, 0)),  # YB (col block)
        ],
        out_specs=pl.BlockSpec((tile, tile), lambda i, j: (i, j)),
        compiler_params=pltpu.CompilerParams(
            dimension_semantics=("parallel", "parallel")),
    )(big_arr, XA, XB, YA, YB)
    return core, big, n_pad


# ---------------------------------------------------------------------------
# Public API: the compact (2n+1, 2n+1) matrix (parity with the PyTorch ref).
# Border row/col are O(n) work and are assembled outside the kernel.
# ---------------------------------------------------------------------------
@jax.jit
def make_r_cross_matrix(X, Y):
    n = X.shape[0]
    core, big, n_pad = _build_core(X, Y)
    XXb = core[:n, :n]
    TR = core[:n, n_pad:n_pad + n]
    BL = core[n_pad:n_pad + n, :n]
    BR = core[n_pad:n_pad + n, n_pad:n_pad + n]
    top = jnp.concatenate([XXb, TR, jnp.zeros((n, 1), jnp.float32)], axis=1)
    mid = jnp.concatenate([BL, BR, jnp.full((n, 1), big, jnp.float32)], axis=1)
    bot = jnp.concatenate(
        [jnp.zeros((1, n), jnp.float32),
         jnp.full((1, n), big, jnp.float32),
         jnp.zeros((1, 1), jnp.float32)], axis=1)
    return jnp.concatenate([top, mid, bot], axis=0)


# ---------------------------------------------------------------------------
# H0 total persistence (finite bars) = sum of single-linkage / MST merge
# heights.  Runs Prim directly on the padded core: the "extra" border vertex
# of M is the (virtual) start vertex, padded duplicate vertices are never
# selectable, so the result equals Prim on the compact M exactly.
# ---------------------------------------------------------------------------
def _h0_total_persistence_core(core, big, n, n_pad, q=1.0):
    L = core.shape[0]                      # 2 * n_pad
    col = jnp.arange(L)
    valid = (col < n) | ((col >= n_pad) & (col < n_pad + n))
    # Border-vertex row of M: 0 to the X half, big to the Y half.
    dist0 = jnp.where(col < n_pad, jnp.float32(0.0), big).astype(jnp.float32)
    visited0 = jnp.logical_not(valid)      # padded vertices are masked out
    inf = jnp.float32(jnp.inf)

    def body(_, carry):
        dist, visited, total = carry
        d = jnp.where(visited, inf, dist)
        j = jnp.argmin(d)
        w = jnp.maximum(d[j], 0.0)
        total = total + (w if q == 1.0 else w ** q)
        visited = visited.at[j].set(True)
        dist = jnp.minimum(dist, core[j])
        return dist, visited, total

    _, _, total = lax.fori_loop(
        0, 2 * n, body, (dist0, visited0, jnp.float32(0.0)))
    return total


@functools.partial(jax.jit, static_argnames=("maxdim", "q"))
def rtd_forward(X, Y, maxdim=1, q=1.0):
    """Forward pass of RTD: one total-persistence value per homology dim."""
    n = X.shape[0]
    core, big, n_pad = _build_core(X, Y)
    tot_pers = [_h0_total_persistence_core(core, big, n, n_pad, q)]
    for _ in range(1, maxdim + 1):
        # TODO(synk): Vietoris-Rips persistence for dims >= 1 needs boundary-
        # matrix reduction, which has no clean Pallas equivalent.
        tot_pers.append(jnp.zeros((), jnp.float32))
    return jnp.stack(tot_pers)


if __name__ == "__main__":
    key = jax.random.PRNGKey(0)
    kx, ky = jax.random.split(key)
    n, d = 8, 4                            # n points, d features -> M is (17, 17)
    X = jax.random.normal(kx, (n, d), dtype=jnp.float32)
    Y = jax.random.normal(ky, (n, d), dtype=jnp.float32)

    M = make_r_cross_matrix(X, Y)
    jax.block_until_ready(M)
    assert M.shape == (2 * n + 1, 2 * n + 1)

    out = rtd_forward(X, Y, maxdim=1, q=1.0)
    jax.block_until_ready(out)
    assert out.shape == (2,)
    print("KERNEL_OK")
</pallas_src>

<mosaic_0001>
module attributes {stable_mosaic.version = 11 : i64} {
  func.func @_max_d2_kernel(%arg0: i32, %arg1: i32, %arg2: memref<128x128xf32, #tpu.memory_space<vmem>>, %arg3: memref<128x128xf32, #tpu.memory_space<vmem>>, %arg4: memref<8x128xf32, #tpu.memory_space<vmem>>) attributes {dimension_semantics = [#tpu.dimension_semantics<arbitrary>, #tpu.dimension_semantics<arbitrary>], iteration_bounds = array<i64: 1, 1>, scalar_prefetch = 0 : i64, scratch_operands = 0 : i64, tpu.core_type = #tpu.core_type<tc>, window_params = [{transform_indices = @transform_0, window_bounds = array<i64: 128, 128>}, {transform_indices = @transform_1, window_bounds = array<i64: 128, 128>}, {pipeline_mode = #tpu.pipeline_mode<synchronous>, transform_indices = @transform_2, window_bounds = array<i64: 8, 128>}]} {
    %c0_i32 = arith.constant 0 : i32
    %0 = arith.cmpi eq, %arg0, %c0_i32 : i32
    %c0_i32_0 = arith.constant 0 : i32
    %1 = arith.cmpi eq, %arg1, %c0_i32_0 : i32
    %2 = arith.andi %0, %1 : i1
    %3 = arith.extui %2 : i1 to i32
    %c0_i32_1 = arith.constant 0 : i32
    %4 = arith.cmpi ne, %3, %c0_i32_1 : i32
    scf.if %4 {
      %cst_10 = arith.constant 0.000000e+00 : f32
      %16 = vector.broadcast %cst_10 : f32 to vector<8x128xf32>
      %c0_11 = arith.constant 0 : index
      %c0_12 = arith.constant 0 : index
      %17 = vector.load %arg4[%c0_11, %c0_12] : memref<8x128xf32, #tpu.memory_space<vmem>>, vector<8x128xf32>
      tpu.vector_store %arg4[%c0_11, %c0_12], %16 {strides = array<i32>} : memref<8x128xf32, #tpu.memory_space<vmem>>, vector<8x128xf32>,
    } else {
    }
    %c0 = arith.constant 0 : index
    %c0_2 = arith.constant 0 : index
    %5 = vector.load %arg2[%c0, %c0_2] : memref<128x128xf32, #tpu.memory_space<vmem>>, vector<128x128xf32>
    %c0_3 = arith.constant 0 : index
    %c0_4 = arith.constant 0 : index
    %6 = vector.load %arg3[%c0_3, %c0_4] : memref<128x128xf32, #tpu.memory_space<vmem>>, vector<128x128xf32>
    %cst = arith.constant dense<0.000000e+00> : vector<128x128xf32>
    %7 = tpu.matmul %5, %6, %cst {dimension_numbers = #tpu.dot_dimension_numbers<[1], [1], [0], [0], [0, 0, 1, 0], [], []>} : vector<128x128xf32>, vector<128x128xf32>, vector<128x128xf32> -> vector<128x128xf32>
    %c0_5 = arith.constant 0 : index
    %c0_6 = arith.constant 0 : index
    %8 = vector.load %arg4[%c0_5, %c0_6] : memref<8x128xf32, #tpu.memory_space<vmem>>, vector<8x128xf32>
    %9 = vector.shape_cast %7 : vector<128x128xf32> to vector<1x128x128xf32>
    %cst_7 = arith.constant dense<0xFF800000> : vector<1xf32>
    %10 = vector.multi_reduction <maximumf>, %9, %cst_7 [1, 2] : vector<1x128x128xf32> to vector<1xf32>
    %11 = vector.shape_cast %10 : vector<1xf32> to vector<1x1x1xf32>
    %12 = vector.extract %11[0, 0, 0] : f32 from vector<1x1x1xf32>
    %13 = vector.broadcast %12 : f32 to vector<8x128xf32>
    %14 = arith.maximumf %8, %13 : vector<8x128xf32>
    %c0_8 = arith.constant 0 : index
    %c0_9 = arith.constant 0 : index
    %15 = vector.load %arg4[%c0_8, %c0_9] : memref<8x128xf32, #tpu.memory_space<vmem>>, vector<8x128xf32>
    tpu.vector_store %arg4[%c0_8, %c0_9], %14 {strides = array<i32>} : memref<8x128xf32, #tpu.memory_space<vmem>>, vector<8x128xf32>,
    return
  }
  func.func @transform_0(%arg0: i32, %arg1: i32) -> (i32, i32) {
    %c0_i32 = arith.constant 0 : i32
    %c0_i32_0 = arith.constant 0 : i32
    return %arg0, %c0_i32 : i32, i32
  }
  func.func @transform_1(%arg0: i32, %arg1: i32) -> (i32, i32) {
    %c0_i32 = arith.constant 0 : i32
    %c0_i32_0 = arith.constant 0 : i32
    return %arg1, %c0_i32 : i32, i32
  }
  func.func @transform_2(%arg0: i32, %arg1: i32) -> (i32, i32) {
    %c0_i32 = arith.constant 0 : i32
    %c0_i32_0 = arith.constant 0 : i32
    %c0_i32_1 = arith.constant 0 : i32
    return %c0_i32, %c0_i32_0 : i32, i32
  }
}

module attributes {stable_mosaic.version = 11 : i64} {
  func.func @_core_kernel(%arg0: i32, %arg1: i32, %arg2: memref<1x1xf32, #tpu.memory_space<vmem>>, %arg3: memref<128x128xf32, #tpu.memory_space<vmem>>, %arg4: memref<128x128xf32, #tpu.memory_space<vmem>>, %arg5: memref<128x128xf32, #tpu.memory_space<vmem>>, %arg6: memref<128x128xf32, #tpu.memory_space<vmem>>, %arg7: memref<128x128xf32, #tpu.memory_space<vmem>>) attributes {dimension_semantics = [#tpu.dimension_semantics<parallel>, #tpu.dimension_semantics<parallel>], iteration_bounds = array<i64: 2, 2>, scalar_prefetch = 0 : i64, scratch_operands = 0 : i64, tpu.core_type = #tpu.core_type<tc>, window_params = [{pipeline_mode = #tpu.pipeline_mode<synchronous>, transform_indices = @transform_0, window_bounds = array<i64: 1, 1>}, {transform_indices = @transform_1, window_bounds = array<i64: 128, 128>}, {transform_indices = @transform_2, window_bounds = array<i64: 128, 128>}, {transform_indices = @transform_3, window_bounds = array<i64: 128, 128>}, {transform_indices = @transform_4, window_bounds = array<i64: 128, 128>}, {transform_indices = @transform_5, window_bounds = array<i64: 128, 128>}]} {
    %c0 = arith.constant 0 : index
    %c0_0 = arith.constant 0 : index
    %0 = vector.load %arg2[%c0, %c0_0] : memref<1x1xf32, #tpu.memory_space<vmem>>, vector<1x1xf32>
    %1 = vector.extract %0[0, 0] : f32 from vector<1x1xf32>
    %c0_1 = arith.constant 0 : index
    %c0_2 = arith.constant 0 : index
    %2 = vector.load %arg3[%c0_1, %c0_2] : memref<128x128xf32, #tpu.memory_space<vmem>>, vector<128x128xf32>
    %c0_3 = arith.constant 0 : index
    %c0_4 = arith.constant 0 : index
    %3 = vector.load %arg4[%c0_3, %c0_4] : memref<128x128xf32, #tpu.memory_space<vmem>>, vector<128x128xf32>
    %cst = arith.constant dense<0.000000e+00> : vector<128x128xf32>
    %4 = tpu.matmul %2, %3, %cst {dimension_numbers = #tpu.dot_dimension_numbers<[1], [1], [0], [0], [0, 0, 1, 0], [], []>} : vector<128x128xf32>, vector<128x128xf32>, vector<128x128xf32> -> vector<128x128xf32>
    %cst_5 = arith.constant 0.000000e+00 : f32
    %5 = vector.broadcast %cst_5 : f32 to vector<128x128xf32>
    %6 = arith.maximumf %4, %5 : vector<128x128xf32>
    %7 = math.sqrt %6 : vector<128x128xf32>
    %c1_i32 = arith.constant 1 : i32
    %8 = arith.cmpi slt, %arg0, %c1_i32 : i32
    %c1_i32_6 = arith.constant 1 : i32
    %9 = arith.cmpi slt, %arg1, %c1_i32_6 : i32
    %10 = arith.andi %8, %9 : i1
    %11 = arith.extui %10 : i1 to i32
    %c0_i32 = arith.constant 0 : i32
    %12 = arith.cmpi ne, %11, %c0_i32 : i32
    scf.if %12 {
      %c0_13 = arith.constant 0 : index
      %c0_14 = arith.constant 0 : index
      %26 = vector.load %arg7[%c0_13, %c0_14] : memref<128x128xf32, #tpu.memory_space<vmem>>, vector<128x128xf32>
      tpu.vector_store %arg7[%c0_13, %c0_14], %7 {strides = array<i32>} : memref<128x128xf32, #tpu.memory_space<vmem>>, vector<128x128xf32>,
    } else {
    }
    %true = arith.constant true
    %13 = arith.xori %9, %true : i1
    %14 = arith.andi %8, %13 : i1
    %15 = arith.extui %14 : i1 to i32
    %c0_i32_7 = arith.constant 0 : i32
    %16 = arith.cmpi ne, %15, %c0_i32_7 : i32
    scf.if %16 {
      %26 = tpu.iota {dimensions = array<i32: 0>} : vector<128x128xi32>
      %c128_i32 = arith.constant 128 : i32
      %27 = arith.muli %arg0, %c128_i32 : i32
      %28 = vector.broadcast %27 : i32 to vector<128x128xi32>
      %29 = arith.addi %26, %28 : vector<128x128xi32>
      %30 = tpu.iota {dimensions = array<i32: 1>} : vector<128x128xi32>
      %c1_i32_13 = arith.constant 1 : i32
      %31 = arith.subi %arg1, %c1_i32_13 : i32
      %c128_i32_14 = arith.constant 128 : i32
      %32 = arith.muli %31, %c128_i32_14 : i32
      %33 = vector.broadcast %32 : i32 to vector<128x128xi32>
      %34 = arith.addi %30, %33 : vector<128x128xi32>
      %35 = arith.cmpi sle, %29, %34 : vector<128x128xi32>
      %36 = vector.broadcast %1 : f32 to vector<128x128xf32>
      %37 = arith.select %35, %7, %36 : vector<128x128xi1>, vector<128x128xf32>
      %c0_15 = arith.constant 0 : index
      %c0_16 = arith.constant 0 : index
      %38 = vector.load %arg7[%c0_15, %c0_16] : memref<128x128xf32, #tpu.memory_space<vmem>>, vector<128x128xf32>
      tpu.vector_store %arg7[%c0_15, %c0_16], %37 {strides = array<i32>} : memref<128x128xf32, #tpu.memory_space<vmem>>, vector<128x128xf32>,
    } else {
    }
    %true_8 = arith.constant true
    %17 = arith.xori %8, %true_8 : i1
    %18 = arith.andi %17, %9 : i1
    %19 = arith.extui %18 : i1 to i32
    %c0_i32_9 = arith.constant 0 : i32
    %20 = arith.cmpi ne, %19, %c0_i32_9 : i32
    scf.if %20 {
      %26 = tpu.iota {dimensions = array<i32: 0>} : vector<128x128xi32>
      %c1_i32_13 = arith.constant 1 : i32
      %27 = arith.subi %arg0, %c1_i32_13 : i32
      %c128_i32 = arith.constant 128 : i32
      %28 = arith.muli %27, %c128_i32 : i32
      %29 = vector.broadcast %28 : i32 to vector<128x128xi32>
      %30 = arith.addi %26, %29 : vector<128x128xi32>
      %31 = tpu.iota {dimensions = array<i32: 1>} : vector<128x128xi32>
      %c128_i32_14 = arith.constant 128 : i32
      %32 = arith.muli %arg1, %c128_i32_14 : i32
      %33 = vector.broadcast %32 : i32 to vector<128x128xi32>
      %34 = arith.addi %31, %33 : vector<128x128xi32>
      %35 = arith.cmpi sge, %30, %34 : vector<128x128xi32>
      %36 = vector.broadcast %1 : f32 to vector<128x128xf32>
      %37 = arith.select %35, %7, %36 : vector<128x128xi1>, vector<128x128xf32>
      %c0_15 = arith.constant 0 : index
      %c0_16 = arith.constant 0 : index
      %38 = vector.load %arg7[%c0_15, %c0_16] : memref<128x128xf32, #tpu.memory_space<vmem>>, vector<128x128xf32>
      tpu.vector_store %arg7[%c0_15, %c0_16], %37 {strides = array<i32>} : memref<128x128xf32, #tpu.memory_space<vmem>>, vector<128x128xf32>,
    } else {
    }
    %true_10 = arith.constant true
    %21 = arith.xori %8, %true_10 : i1
    %true_11 = arith.constant true
    %22 = arith.xori %9, %true_11 : i1
    %23 = arith.andi %21, %22 : i1
    %24 = arith.extui %23 : i1 to i32
    %c0_i32_12 = arith.constant 0 : i32
    %25 = arith.cmpi ne, %24, %c0_i32_12 : i32
    scf.if %25 {
      %c0_13 = arith.constant 0 : index
      %c0_14 = arith.constant 0 : index
      %26 = vector.load %arg5[%c0_13, %c0_14] : memref<128x128xf32, #tpu.memory_space<vmem>>, vector<128x128xf32>
      %c0_15 = arith.constant 0 : index
      %c0_16 = arith.constant 0 : index
      %27 = vector.load %arg6[%c0_15, %c0_16] : memref<128x128xf32, #tpu.memory_space<vmem>>, vector<128x128xf32>
      %cst_17 = arith.constant dense<0.000000e+00> : vector<128x128xf32>
      %28 = tpu.matmul %26, %27, %cst_17 {dimension_numbers = #tpu.dot_dimension_numbers<[1], [1], [0], [0], [0, 0, 1, 0], [], []>} : vector<128x128xf32>, vector<128x128xf32>, vector<128x128xf32> -> vector<128x128xf32>
      %29 = arith.minimumf %4, %28 : vector<128x128xf32>
      %cst_18 = arith.constant 0.000000e+00 : f32
      %30 = vector.broadcast %cst_18 : f32 to vector<128x128xf32>
      %31 = arith.maximumf %29, %30 : vector<128x128xf32>
      %32 = math.sqrt %31 : vector<128x128xf32>
      %c0_19 = arith.constant 0 : index
      %c0_20 = arith.constant 0 : index
      %33 = vector.load %arg7[%c0_19, %c0_20] : memref<128x128xf32, #tpu.memory_space<vmem>>, vector<128x128xf32>
      tpu.vector_store %arg7[%c0_19, %c0_20], %32 {strides = array<i32>} : memref<128x128xf32, #tpu.memory_space<vmem>>, vector<128x128xf32>,
    } else {
    }
    return
  }
  func.func @transform_0(%arg0: i32, %arg1: i32) -> (i32, i32) {
    %c0_i32 = arith.constant 0 : i32
    %c0_i32_0 = arith.constant 0 : i32
    %c0_i32_1 = arith.constant 0 : i32
    return %c0_i32, %c0_i32_0 : i32, i32
  }
  func.func @transform_1(%arg0: i32, %arg1: i32) -> (i32, i32) {
    %c1_i32 = arith.constant 1 : i32
    %c0_i32 = arith.constant 0 : i32
    %0 = arith.cmpi eq, %c1_i32, %c0_i32 : i32
    %c1_i32_0 = arith.constant 1 : i32
    %1 = arith.select %0, %c1_i32_0, %c1_i32 : i32
    %2 = arith.remsi %arg0, %1 : i32
    %c0_i32_1 = arith.constant 0 : i32
    %3 = arith.cmpi ne, %2, %c0_i32_1 : i32
    %c0_i32_2 = arith.constant 0 : i32
    %4 = arith.cmpi slt, %2, %c0_i32_2 : i32
    %c0_i32_3 = arith.constant 0 : i32
    %5 = arith.cmpi slt, %1, %c0_i32_3 : i32
    %6 = arith.xori %4, %5 : i1
    %7 = arith.andi %6, %3 : i1
    %8 = arith.addi %2, %1 : i32
    %9 = arith.select %7, %8, %2 : i32
    %c0_i32_4 = arith.constant 0 : i32
    %c0_i32_5 = arith.constant 0 : i32
    return %9, %c0_i32_4 : i32, i32
  }
  func.func @transform_2(%arg0: i32, %arg1: i32) -> (i32, i32) {
    %c1_i32 = arith.constant 1 : i32
    %c0_i32 = arith.constant 0 : i32
    %0 = arith.cmpi eq, %c1_i32, %c0_i32 : i32
    %c1_i32_0 = arith.constant 1 : i32
    %1 = arith.select %0, %c1_i32_0, %c1_i32 : i32
    %2 = arith.remsi %arg1, %1 : i32
    %c0_i32_1 = arith.constant 0 : i32
    %3 = arith.cmpi ne, %2, %c0_i32_1 : i32
    %c0_i32_2 = arith.constant 0 : i32
    %4 = arith.cmpi slt, %2, %c0_i32_2 : i32
    %c0_i32_3 = arith.constant 0 : i32
    %5 = arith.cmpi slt, %1, %c0_i32_3 : i32
    %6 = arith.xori %4, %5 : i1
    %7 = arith.andi %6, %3 : i1
    %8 = arith.addi %2, %1 : i32
    %9 = arith.select %7, %8, %2 : i32
    %c0_i32_4 = arith.constant 0 : i32
    %c0_i32_5 = arith.constant 0 : i32
    return %9, %c0_i32_4 : i32, i32
  }
  func.func @transform_3(%arg0: i32, %arg1: i32) -> (i32, i32) {
    %c1_i32 = arith.constant 1 : i32
    %c0_i32 = arith.constant 0 : i32
    %0 = arith.cmpi eq, %c1_i32, %c0_i32 : i32
    %c1_i32_0 = arith.constant 1 : i32
    %1 = arith.select %0, %c1_i32_0, %c1_i32 : i32
    %2 = arith.remsi %arg0, %1 : i32
    %c0_i32_1 = arith.constant 0 : i32
    %3 = arith.cmpi ne, %2, %c0_i32_1 : i32
    %c0_i32_2 = arith.constant 0 : i32
    %4 = arith.cmpi slt, %2, %c0_i32_2 : i32
    %c0_i32_3 = arith.constant 0 : i32
    %5 = arith.cmpi slt, %1, %c0_i32_3 : i32
    %6 = arith.xori %4, %5 : i1
    %7 = arith.andi %6, %3 : i1
    %8 = arith.addi %2, %1 : i32
    %9 = arith.select %7, %8, %2 : i32
    %c0_i32_4 = arith.constant 0 : i32
    %c0_i32_5 = arith.constant 0 : i32
    return %9, %c0_i32_4 : i32, i32
  }
  func.func @transform_4(%arg0: i32, %arg1: i32) -> (i32, i32) {
    %c1_i32 = arith.constant 1 : i32
    %c0_i32 = arith.constant 0 : i32
    %0 = arith.cmpi eq, %c1_i32, %c0_i32 : i32
    %c1_i32_0 = arith.constant 1 : i32
    %1 = arith.select %0, %c1_i32_0, %c1_i32 : i32
    %2 = arith.remsi %arg1, %1 : i32
    %c0_i32_1 = arith.constant 0 : i32
    %3 = arith.cmpi ne, %2, %c0_i32_1 : i32
    %c0_i32_2 = arith.constant 0 : i32
    %4 = arith.cmpi slt, %2, %c0_i32_2 : i32
    %c0_i32_3 = arith.constant 0 : i32
    %5 = arith.cmpi slt, %1, %c0_i32_3 : i32
    %6 = arith.xori %4, %5 : i1
    %7 = arith.andi %6, %3 : i1
    %8 = arith.addi %2, %1 : i32
    %9 = arith.select %7, %8, %2 : i32
    %c0_i32_4 = arith.constant 0 : i32
    %c0_i32_5 = arith.constant 0 : i32
    return %9, %c0_i32_4 : i32, i32
  }
  func.func @transform_5(%arg0: i32, %arg1: i32) -> (i32, i32) {
    %c0_i32 = arith.constant 0 : i32
    return %arg0, %arg1 : i32, i32
  }
}

</mosaic_0001>

<bundles_post_ra>
// kernel: make_r_cross_matrix.2
= control target key start
LH: loop header
LB: loop body
LE: loop exit
PB: predicated region body
PF: predicated region fallthrough
CT: control target
= control target key end

     0   :  { %s480_s1 = inlined_call_operand.vmem [shape: f32[128,128], index: 1, kind: input, shape index: {}]   ;;  %s481_s0 = inlined_call_operand.vmem [shape: f32[128,128], index: 0, kind: input, shape index: {}]   ;;  %s482_s2 = inlined_call_operand.vmem [shape: f32[8,128], index: 2, kind: output, shape index: {}]  }
   0x1   :  { %v34_v0 = vld [vmem:[%s480_s1] sm:$0xff]  ;;  %v35_v1 = vld [vmem:[%s480_s1 + $0x8] sm:$0xff]  ;;  %v36_v2 = vld [vmem:[%s480_s1 + $0x10] sm:$0xff] }
   0x2   :  { %v315_v3 = vpack.c.bf16 %v35_v1, %v34_v0  ;;  %v37_v4 = vld [vmem:[%s480_s1 + $0x18] sm:$0xff]  ;;  %v18_v6 = vld [vmem:[%s481_s0] sm:$0xff]  ;;  %v39_v8 = vld [vmem:[%s480_s1 + $0x28] sm:$0xff] }
   0x3   :  { %v319_v5 = vpack.c.bf16 %v37_v4, %v36_v2  ;;  %v38_v7 = vld [vmem:[%s480_s1 + $0x20] sm:$0xff]  ;;  %291 = vmatprep.mubr.f32.mxu0 %v18_v6  ;;  %v40_v11 = vld [vmem:[%s480_s1 + $0x30] sm:$0xff]  ;;  %v41_v12 = vld [vmem:[%s480_s1 + $0x38] sm:$0xff] }
   0x4   :  { %316 = vmatprep.subr.bf16.mxu0 %v315_v3  ;;  %347 = vmatprep.subr.bf16.mxu1 %v315_v3  ;;  %v26_v9 = vld [vmem:[%s481_s0 + $0x40] sm:$0xff]  ;;  %v323_v10 = vpack.c.bf16 %v39_v8, %v38_v7  ;;  %v327_v13 = vpack.c.bf16 %v41_v12, %v40_v11  ;;  %v43_v15 = vld [vmem:[%s480_s1 + $0x48] sm:$0xff]  ;;  %v44_v17 = vld [vmem:[%s480_s1 + $0x50] sm:$0xff] }
   0x5   :  { %318 = vmatpush3.bf16.xpose.msra.mxu0 %v315_v3  ;;  %355 = vmatpush3.bf16.xpose.msra.mxu1 %v315_v3  ;;  %v42_v14 = vld [vmem:[%s480_s1 + $0x40] sm:$0xff]  ;;  %v45_v18 = vld [vmem:[%s480_s1 + $0x58] sm:$0xff]  ;;  %v47_v21 = vld [vmem:[%s480_s1 + $0x68] sm:$0xff] }
   0x6   :  { %320 = vmatprep.subr.bf16.mxu0 %v319_v5  ;;  %348 = vmatprep.subr.bf16.mxu1 %v319_v5  ;;  %v331_v16 = vpack.c.bf16 %v43_v15, %v42_v14  ;;  %v335_v19 = vpack.c.bf16 %v45_v18, %v44_v17  ;;  %v46_v20 = vld [vmem:[%s480_s1 + $0x60] sm:$0xff]  ;;  %v48_v23 = vld [vmem:[%s480_s1 + $0x70] sm:$0xff]  ;;  %v49_v24 = vld [vmem:[%s480_s1 + $0x78] sm:$0xff] }
   0x7   :  { %303 = vmatprep.mubr.f32.mxu1 %v26_v9  ;;  %v339_v22 = vpack.c.bf16 %v47_v21, %v46_v20  ;;  %v343_v25 = vpack.c.bf16 %v49_v24, %v48_v23  ;;  %v19_v26 = vld [vmem:[%s481_s0 + $0x8] sm:$0xff]  ;;  %v20_v28 = vld [vmem:[%s481_s0 + $0x10] sm:$0xff]  ;;  %v21_v30 = vld [vmem:[%s481_s0 + $0x18] sm:$0xff] }
   0x8   :  { %v27_v27 = vld [vmem:[%s481_s0 + $0x48] sm:$0xff]  ;;  %v28_v29 = vld [vmem:[%s481_s0 + $0x50] sm:$0xff]  ;;  %v29_v31 = vld [vmem:[%s481_s0 + $0x58] sm:$0xff] }
   0x9   :  { %v22_v32 = vld [vmem:[%s481_s0 + $0x20] sm:$0xff]  ;;  %v23_v34 = vld [vmem:[%s481_s0 + $0x28] sm:$0xff]  ;;  %v24_v36 = vld [vmem:[%s481_s0 + $0x30] sm:$0xff] }
   0xa   :  { %v30_v33 = vld [vmem:[%s481_s0 + $0x60] sm:$0xff]  ;;  %v31_v35 = vld [vmem:[%s481_s0 + $0x68] sm:$0xff]  ;;  %v32_v37 = vld [vmem:[%s481_s0 + $0x70] sm:$0xff] }
   0xb   :  { %v25_v38 = vld [vmem:[%s481_s0 + $0x38] sm:$0xff] }
   0xc   :  { %v33_v39 = vld [vmem:[%s481_s0 + $0x78] sm:$0xff] }
   0xd   :  { %322 = vmatpush3.bf16.xpose.msra.mxu0 %v319_v5  ;;  %356 = vmatpush3.bf16.xpose.msra.mxu1 %v319_v5 }
   0xe   :  { %324 = vmatprep.subr.bf16.mxu0 %v323_v10  ;;  %349 = vmatprep.subr.bf16.mxu1 %v323_v10 }
  0x15   :  { %326 = vmatpush3.bf16.xpose.msra.mxu0 %v323_v10  ;;  %357 = vmatpush3.bf16.xpose.msra.mxu1 %v323_v10 }
  0x16   :  { %328 = vmatprep.subr.bf16.mxu0 %v327_v13  ;;  %350 = vmatprep.subr.bf16.mxu1 %v327_v13 }
  0x1d   :  { %330 = vmatpush3.bf16.xpose.msra.mxu0 %v327_v13  ;;  %358 = vmatpush3.bf16.xpose.msra.mxu1 %v327_v13 }
  0x1e   :  { %332 = vmatprep.subr.bf16.mxu0 %v331_v16  ;;  %351 = vmatprep.subr.bf16.mxu1 %v331_v16 }
  0x25   :  { %334 = vmatpush3.bf16.xpose.msra.mxu0 %v331_v16  ;;  %359 = vmatpush3.bf16.xpose.msra.mxu1 %v331_v16 }
  0x26   :  { %336 = vmatprep.subr.bf16.mxu0 %v335_v19  ;;  %352 = vmatprep.subr.bf16.mxu1 %v335_v19 }
  0x2d   :  { %338 = vmatpush3.bf16.xpose.msra.mxu0 %v335_v19  ;;  %360 = vmatpush3.bf16.xpose.msra.mxu1 %v335_v19 }
  0x2e   :  { %340 = vmatprep.subr.bf16.mxu0 %v339_v22  ;;  %353 = vmatprep.subr.bf16.mxu1 %v339_v22 }
  0x35   :  { %342 = vmatpush3.bf16.xpose.msra.mxu0 %v339_v22  ;;  %361 = vmatpush3.bf16.xpose.msra.mxu1 %v339_v22 }
  0x36   :  { %344 = vmatprep.subr.bf16.mxu0 %v343_v25  ;;  %354 = vmatprep.subr.bf16.mxu1 %v343_v25 }
  0x3d   :  { %346 = vmatpush3.bf16.xpose.msra.mxu0 %v343_v25  ;;  %362 = vmatpush3.bf16.xpose.msra.mxu1 %v343_v25 }
  0x44   :  { %292 = vmatmul.mubr.f32.vlgmr.msra.gmra.mrb[0].mxu0 %v19_v26  ;;  %304 = vmatmul.mubr.f32.vlgmr.msra.gmra.mrb[0].mxu1 %v27_v27 }
  0x45   :  { %294 = vmatprep.mubr.f32.mxu0 %v20_v28  ;;  %306 = vmatprep.mubr.f32.mxu1 %v28_v29 }
  0x48   :  { %295 = vmatmul.mubr.f32.gmra.mrb[2].mxu0 %v21_v30  ;;  %307 = vmatmul.mubr.f32.gmra.mrb[2].mxu1 %v29_v31 }
  0x49   :  { %297 = vmatprep.mubr.f32.mxu0 %v22_v32  ;;  %309 = vmatprep.mubr.f32.mxu1 %v30_v33 }
  0x4c   :  { %298 = vmatmul.mubr.f32.gmra.mrb[4].mxu0 %v23_v34  ;;  %310 = vmatmul.mubr.f32.gmra.mrb[4].mxu1 %v31_v35 }
  0x4d   :  { %300 = vmatprep.mubr.f32.mxu0 %v24_v36  ;;  %312 = vmatprep.mubr.f32.mxu1 %v32_v37 }
  0x50   :  { %301 = vmatmul.mubr.f32.gmra.mrb[6].mxu0 %v25_v38  ;;  %313 = vmatmul.mubr.f32.gmra.mrb[6].mxu1 %v33_v39 }
 0x117   :  { %v293_v40 = vpop.f32.mrb[0].mxu0  ;;  %v305_v41 = vpop.f32.mrb[0].mxu1 }
 0x118   :  { %v116_v42 = vpop.f32.mrb[1].mxu0  ;;  %v156_v43 = vpop.f32.mrb[1].mxu1 }
 0x11b   :  { %v296_v44 = vpop.f32.mrb[2].mxu0  ;;  %v308_v45 = vpop.f32.mrb[2].mxu1 }
 0x11c   :  { %v126_v46 = vpop.f32.mrb[3].mxu0  ;;  %v166_v47 = vpop.f32.mrb[3].mxu1 }
 0x11f   :  { %v299_v48 = vpop.f32.mrb[4].mxu0  ;;  %v311_v49 = vpop.f32.mrb[4].mxu1 }
 0x120   :  { %v197_v50 = vmax.f32 %v293_v40, %v299_v48  ;;  %v136_v51 = vpop.f32.mrb[5].mxu0  ;;  %v176_v52 = vpop.f32.mrb[5].mxu1 }
 0x121   :  { %v196_v53 = vmax.f32 %v116_v42, %v136_v51 }
 0x122   :  { %v201_v54 = vmax.f32 %v197_v50, %v305_v41 }
 0x123   :  { %v302_v55 = vpop.f32.mrb[6].mxu0  ;;  %v200_v56 = vmax.f32 %v196_v53, %v156_v43  ;;  %v314_v57 = vpop.f32.mrb[6].mxu1 }
 0x124   :  { %v205_v58 = vmax.f32 %v201_v54, %v311_v49  ;;  %v199_v59 = vmax.f32 %v296_v44, %v302_v55  ;;  %v146_v60 = vpop.f32.mrb[7].mxu0  ;;  %v186_v61 = vpop.f32.mrb[7].mxu1 }
 0x125   :  { %v204_v62 = vmax.f32 %v200_v56, %v176_v52  ;;  %v198_v63 = vmax.f32 %v126_v46, %v146_v60 }
 0x126   :  { %v203_v0 = vmax.f32 %v199_v59, %v308_v45 }
 0x127   :  { %v202_v1 = vmax.f32 %v198_v63, %v166_v47  ;;  %v208_v2 = vmax.f32 %v204_v62, %v205_v58 }
 0x128   :  { %v207_v3 = vmax.f32 %v203_v0, %v314_v57 }
 0x129   :  { %v206_v4 = vmax.f32 %v202_v1, %v186_v61 }
 0x12b   :  { %v209_v5 = vmax.f32 %v206_v4, %v207_v3 }
 0x12d   :  { %v210_v6 = vmax.f32 %v208_v2, %v209_v5 }
 0x12f   :  { %211 = vmax.xlane.f32.xlu0 %v210_v6 }
 0x1bc   :  { %v212_v7 = vpop.xlane.xlu0 %211 }
 0x1bd   :  { %v213_v8 = vrot.slane %v212_v7, 4 }
 0x1bf   :  { %v214_v9 = vmax.f32 %v212_v7, %v213_v8 }
 0x1c1   :  { %v215_v10 = vrot.slane %v214_v9, 2 }
 0x1c3   :  { %v216_v11 = vmax.f32 %v214_v9, %v215_v10 }
 0x1c5   :  { %v217_v12 = vrot.slane %v216_v11, 1 }
 0x1c7   :  { %v218_v13 = vmax.f32 %v216_v11, %v217_v12 }
 0x1c9   :  { %363 = vpush %v218_v13 }
 0x1fa   :  { %s364_s0 = spop %363 }
 0x1fb   :  { %v220_v14 = vstv %s364_s0 }
 0x1fc   :  { %v221_v15 = vmax.f32 %v220_v14, 0.0 }
 0x1fe   :  { %222 = vst [vmem:[%s482_s2] sm:$0xff] %v221_v15 }

// kernel: make_r_cross_matrix.3
= control target key start
LH: loop header
LB: loop body
LE: loop exit
PB: predicated region body
PF: predicated region fallthrough
CT: control target
= control target key end

     0   :  { %s2680_s0 = inlined_call_operand.<no memory space> [shape: f32[1,1], index: 0, kind: input, shape index: {}]   ;;  %s2681_s1 = inlined_call_operand.vmem [shape: f32[128,128], index: 1, kind: input, shape index: {}]   ;;  %s2682_s2 = inlined_call_operand.vmem [shape: f32[128,128], index: 2, kind: input, shape index: {}]   ;;  %s2683_s3 = inlined_call_operand.vmem [shape: f32[128,128], index: 3, kind: input, shape index: {}]   ;;  %s2684_s4 = inlined_call_operand.vmem [shape: f32[128,128], index: 4, kind: input, shape index: {}]   ;;  %s2685_s5 = inlined_call_operand.vmem [shape: f32[256,256], index: 5, kind: output, shape index: {}]  }
   0x1   :  { %v10_v0 = vstv %s2680_s0 }
   0x2   :  { %11 = vst [vmem:[#allocation2] sm:$0x1] %v10_v0 }
   0x3   :  { %s1733_s20 = smov 0   ;;  %s1735_s21 = smov 0  }
   0x4   :  { %s1737_s22 = smov 0   ;;  %s1739_s23 = smov 0  }
   0x5   :  { %s1741_s24 = smov 0   ;;  %s1743_s25 = smov 0  }
   0x6   :  { %s1745_s26 = smov 0  }
   0x7 LB: > { %s26_s0 = sadd.s32 1, %s1690_s24  ;;  %s29_s27 = sadd.s32 1, %s1694_s25  ;;  %s1698_s26 = sphi %s1745_s26, %s17_s26   ;;  %s1694_s25 = sphi %s1743_s25, %s2693_s25   ;;  %s1690_s24 = sphi %s1741_s24, %s2692_s24   ;;  %s1686_s23 = sphi %s1739_s23, %s2691_s23   ;;  %s1682_s22 = sphi %s1737_s22, %s2690_s22   ;;  %s1678_s21 = sphi %s1735_s21, %s2689_s21   ;;  %s1674_s20 = sphi %s1733_s20, %s2688_s20  }
   0x8   : > { %p27_p0 = scmp.ge.s32.totalorder %s26_s0, 2  ;;  %s1232_s28 = sadd.s32 4294967295, %s1698_s26  }
   0x9   : > { %p153_p1 = scmp.ne.s32.totalorder %s1678_s21, %s1674_s20  ;;  %p154_p2 = scmp.eq.s32.totalorder %s1232_s28, 3 }
   0xa   : > { %s2695_s0 = smov (%p27_p0, %s26_s0), 0  ;;  %s2697_s27 = smov (!%p27_p0, %s29_s27), %s1694_s25 }
   0xb   : > { %s139_s29 = ssub.s32 %s1690_s24, %s2695_s0  ;;  %p31_p3 = scmp.ge.s32.totalorder %s2697_s27, 2 }
   0xc   : > { %p1235_p4 = scmp.ge.s32.totalorder %s1698_s26, 1  ;;  %p1779_p5 = por %p154_p2, %p153_p1 }
   0xd   : > { %p193_p6 = scmp.lt.s32.totalorder %s1698_s26, 5  ;;  %s2699_s27 = smov (%p31_p3, %s2697_s27), 0 }
   0xe   : > { %s138_s6 = ssub.s32 %s1694_s25, %s2699_s27  ;;  %s143_s8 = sadd.s32 1, %s1678_s21 }
   0xf   : > { %p194_p7 = pnand %p1235_p4, %p193_p6  ;;  %s140_s7 = sor.u32 %s139_s29, %s138_s6 }
  0x10   : > { %p141_p8 = scmp.eq.s32.totalorder %s140_s7, 0  ;;  %v234_v1 = vld [vmem:[%s2682_s2] sm:$0xff] (!%p194_p7)  ;;  %v235_v2 = vld [vmem:[%s2682_s2 + $0x8] sm:$0xff] (!%p194_p7)  ;;  %v236_v3 = vld [vmem:[%s2682_s2 + $0x10] sm:$0xff] (!%p194_p7)  ;;  %s212_s16 = sand.u32 (!%p194_p7), 1, %s1674_s20  }
  0x11   : > { %197 = sbr.rel (%p194_p7) target bundleno = 728 (0x2d8), region = 40  ;;  %v1426_v4 = vpack.c.bf16 (!%p194_p7), %v235_v2, %v234_v1  ;;  %v237_v5 = vld [vmem:[%s2682_s2 + $0x18] sm:$0xff] (!%p194_p7)  ;;  %s1805_s19 = sshll.u32 (!%p194_p7), %s212_s16, 7  ;;  %v218_v7 = vld [vmem:[%s2681_s1] sm:$0xff] (!%p194_p7)  ;;  %v239_v10 = vld [vmem:[%s2682_s2 + $0x28] sm:$0xff] (!%p194_p7) }
  0x12   : > { %s1790_s9 = scalar_select %p141_p8, %s1678_s21, %s143_s8  }
  0x13   : > { %v1430_v6 = vpack.c.bf16 (!%p194_p7), %v237_v5, %v236_v3  ;;  %1427 = vmatprep.subr.bf16.mxu0 (!%p194_p7), %v1426_v4  ;;  %1490 = vmatprep.subr.bf16.mxu1 (!%p194_p7), %v1426_v4  ;;  %v226_v8 = vld [vmem:[%s2681_s1 + $0x40] sm:$0xff] (!%p194_p7)  ;;  %v240_v13 = vld [vmem:[%s2682_s2 + $0x30] sm:$0xff] (!%p194_p7)  ;;  %v241_v14 = vld [vmem:[%s2682_s2 + $0x38] sm:$0xff] (!%p194_p7)  ;;  %p523_p9 = scmp.lt.s32.totalorder (!%p194_p7), %s1686_s23, 1  ;;  %p524_p10 = scmp.lt.s32.totalorder (!%p194_p7), %s1682_s22, 1 }
  0x14   : > { %1429 = vmatpush3.bf16.xpose.msra.mxu0 (!%p194_p7), %v1426_v4  ;;  %1498 = vmatpush3.bf16.xpose.msra.mxu1 (!%p194_p7), %v1426_v4  ;;  %v238_v9 = vld [vmem:[%s2682_s2 + $0x20] sm:$0xff] (!%p194_p7)  ;;  %v1438_v15 = vpack.c.bf16 (!%p194_p7), %v241_v14, %v240_v13  ;;  %v243_v17 = vld [vmem:[%s2682_s2 + $0x48] sm:$0xff] (!%p194_p7)  ;;  %v244_v19 = vld [vmem:[%s2682_s2 + $0x50] sm:$0xff] (!%p194_p7)  ;;  %s2122_s17 = scalar_lea.vmem (!%p194_p7), [#allocation3], %s1805_s19 }
  0x15   : > { %1431 = vmatprep.subr.bf16.mxu0 (!%p194_p7), %v1430_v6  ;;  %1491 = vmatprep.subr.bf16.mxu1 (!%p194_p7), %v1430_v6  ;;  %v1434_v11 = vpack.c.bf16 (!%p194_p7), %v239_v10, %v238_v9  ;;  %v216_v12 = vld [vmem:[#allocation2] sm:$0x1] (!%p194_p7)  ;;  %v245_v20 = vld [vmem:[%s2682_s2 + $0x58] sm:$0xff] (!%p194_p7)  ;;  %v247_v23 = vld [vmem:[%s2682_s2 + $0x68] sm:$0xff] (!%p194_p7)  ;;  %p1899_p11 = pnand (!%p194_p7), %p524_p10, %p523_p9 }
  0x16   : > { %1346 = vmatprep.mubr.f32.mxu0 (!%p194_p7), %v218_v7  ;;  %1358 = vmatprep.mubr.f32.mxu1 (!%p194_p7), %v226_v8  ;;  %1522 = vpush (!%p194_p7), %v216_v12  ;;  %v242_v16 = vld [vmem:[%s2682_s2 + $0x40] sm:$0xff] (!%p194_p7)  ;;  %v1446_v21 = vpack.c.bf16 (!%p194_p7), %v245_v20, %v244_v19  ;;  %v248_v25 = vld [vmem:[%s2682_s2 + $0x70] sm:$0xff] (!%p194_p7)  ;;  %v249_v26 = vld [vmem:[%s2682_s2 + $0x78] sm:$0xff] (!%p194_p7) }
  0x17   : > { %v1442_v18 = vpack.c.bf16 (!%p194_p7), %v243_v17, %v242_v16  ;;  %v246_v22 = vld [vmem:[%s2682_s2 + $0x60] sm:$0xff] (!%p194_p7)  ;;  %v1454_v27 = vpack.c.bf16 (!%p194_p7), %v249_v26, %v248_v25  ;;  %v219_v28 = vld [vmem:[%s2681_s1 + $0x8] sm:$0xff] (!%p194_p7)  ;;  %v220_v30 = vld [vmem:[%s2681_s1 + $0x10] sm:$0xff] (!%p194_p7) }
  0x18   : > { %v1450_v24 = vpack.c.bf16 %v247_v23, %v246_v22  ;;  %v227_v29 = vld [vmem:[%s2681_s1 + $0x48] sm:$0xff]  ;;  %v228_v31 = vld [vmem:[%s2681_s1 + $0x50] sm:$0xff]  ;;  %v221_v32 = vld [vmem:[%s2681_s1 + $0x18] sm:$0xff] }
  0x19   : > { %v229_v33 = vld [vmem:[%s2681_s1 + $0x58] sm:$0xff]  ;;  %v222_v34 = vld [vmem:[%s2681_s1 + $0x20] sm:$0xff]  ;;  %v223_v36 = vld [vmem:[%s2681_s1 + $0x28] sm:$0xff] }
  0x1a   : > { %v230_v35 = vld [vmem:[%s2681_s1 + $0x60] sm:$0xff]  ;;  %v231_v37 = vld [vmem:[%s2681_s1 + $0x68] sm:$0xff]  ;;  %v224_v38 = vld [vmem:[%s2681_s1 + $0x30] sm:$0xff] }
  0x1b   : > { %v232_v39 = vld [vmem:[%s2681_s1 + $0x70] sm:$0xff]  ;;  %v225_v40 = vld [vmem:[%s2681_s1 + $0x38] sm:$0xff] }
  0x1c   : > { %1433 = vmatpush3.bf16.xpose.msra.mxu0 %v1430_v6  ;;  %1499 = vmatpush3.bf16.xpose.msra.mxu1 %v1430_v6  ;;  %v233_v41 = vld [vmem:[%s2681_s1 + $0x78] sm:$0xff] }
  0x1d   : > { %1435 = vmatprep.subr.bf16.mxu0 %v1434_v11  ;;  %1492 = vmatprep.subr.bf16.mxu1 %v1434_v11 }
  0x24   : > { %1437 = vmatpush3.bf16.xpose.msra.mxu0 %v1434_v11  ;;  %1500 = vmatpush3.bf16.xpose.msra.mxu1 %v1434_v11 }
  0x25   : > { %1439 = vmatprep.subr.bf16.mxu0 %v1438_v15  ;;  %1493 = vmatprep.subr.bf16.mxu1 %v1438_v15 }
  0x2c   : > { %1441 = vmatpush3.bf16.xpose.msra.mxu0 %v1438_v15  ;;  %1501 = vmatpush3.bf16.xpose.msra.mxu1 %v1438_v15 }
  0x2d   : > { %1443 = vmatprep.subr.bf16.mxu0 %v1442_v18  ;;  %1494 = vmatprep.subr.bf16.mxu1 %v1442_v18 }
  0x34   : > { %1445 = vmatpush3.bf16.xpose.msra.mxu0 %v1442_v18  ;;  %1502 = vmatpush3.bf16.xpose.msra.mxu1 %v1442_v18 }
  0x35   : > { %1447 = vmatprep.subr.bf16.mxu0 %v1446_v21  ;;  %1495 = vmatprep.subr.bf16.mxu1 %v1446_v21 }
  0x3c   : > { %1449 = vmatpush3.bf16.xpose.msra.mxu0 %v1446_v21  ;;  %1503 = vmatpush3.bf16.xpose.msra.mxu1 %v1446_v21 }
  0x3d   : > { %1451 = vmatprep.subr.bf16.mxu0 %v1450_v24  ;;  %1496 = vmatprep.subr.bf16.mxu1 %v1450_v24 }
  0x44   : > { %1453 = vmatpush3.bf16.xpose.msra.mxu0 %v1450_v24  ;;  %1504 = vmatpush3.bf16.xpose.msra.mxu1 %v1450_v24 }
  0x45   : > { %1455 = vmatprep.subr.bf16.mxu0 %v1454_v27  ;;  %1497 = vmatprep.subr.bf16.mxu1 %v1454_v27 }
  0x47   : > { %s1893_s15 = spop %1522 }
  0x4c   : > { %1457 = vmatpush3.bf16.xpose.msra.mxu0 %v1454_v27  ;;  %1505 = vmatpush3.bf16.xpose.msra.mxu1 %v1454_v27 }
  0x53   : > { %1347 = vmatmul.mubr.f32.vlgmr.msra.gmra.mrb[0].mxu0 %v219_v28  ;;  %1359 = vmatmul.mubr.f32.vlgmr.msra.gmra.mrb[0].mxu1 %v227_v29 }
  0x54   : > { %1349 = vmatprep.mubr.f32.mxu0 %v220_v30  ;;  %1361 = vmatprep.mubr.f32.mxu1 %v228_v31 }
  0x57   : > { %1350 = vmatmul.mubr.f32.gmra.mrb[2].mxu0 %v221_v32  ;;  %1362 = vmatmul.mubr.f32.gmra.mrb[2].mxu1 %v229_v33 }
  0x58   : > { %1352 = vmatprep.mubr.f32.mxu0 %v222_v34  ;;  %1364 = vmatprep.mubr.f32.mxu1 %v230_v35 }
  0x5b   : > { %1353 = vmatmul.mubr.f32.gmra.mrb[4].mxu0 %v223_v36  ;;  %1365 = vmatmul.mubr.f32.gmra.mrb[4].mxu1 %v231_v37 }
  0x5c   : > { %1355 = vmatprep.mubr.f32.mxu0 %v224_v38  ;;  %1367 = vmatprep.mubr.f32.mxu1 %v232_v39 }
  0x5f   : > { %1356 = vmatmul.mubr.f32.gmra.mrb[6].mxu0 %v225_v40  ;;  %1368 = vmatmul.mubr.f32.gmra.mrb[6].mxu1 %v233_v41 }
 0x126   : > { %v1903_v42 = vpop.f32.mrb[0].mxu0  ;;  %v1905_v43 = vpop.f32.mrb[0].mxu1 }
 0x127   : > { %v396_v44 = vmax.f32 %v1903_v42, 0.0  ;;  %v1909_v45 = vmax.f32 %v1905_v43, 0.0  ;;  %v1911_v46 = vpop.f32.mrb[1].mxu0  ;;  %v1913_v47 = vpop.f32.mrb[1].mxu1 }
 0x128   : > { %v1916_v48 = vmax.f32 %v1911_v46, 0.0  ;;  %v1919_v49 = vmax.f32 %v1913_v47, 0.0 }
 0x129   : > { %1580 = vrsqrt.f32 %v396_v44  ;;  %vm420_vm0 = vcmp.eq.f32.partialorder %v396_v44, inf  ;;  %vm422_vm1 = vcmp.eq.f32.partialorder %v396_v44, 0.0  ;;  %v423_v62 = vand.u32 2147483648, %v396_v44 }
 0x12a   : > { %1582 = vrsqrt.f32 %v1909_v45  ;;  %v1922_v50 = vpop.f32.mrb[2].mxu0  ;;  %v1924_v51 = vpop.f32.mrb[2].mxu1  ;;  %vm476_vm2 = vcmp.eq.f32.partialorder %v1909_v45, inf  ;;  %vm478_vm3 = vcmp.eq.f32.partialorder %v1909_v45, 0.0  ;;  %v479_v63 = vand.u32 2147483648, %v1909_v45 }
 0x12b   : > { %1584 = vrsqrt.f32 %v1916_v48  ;;  %v1927_v52 = vpop.f32.mrb[3].mxu0  ;;  %v1929_v53 = vpop.f32.mrb[3].mxu1  ;;  %v1933_v54 = vmax.f32 %v1922_v50, 0.0  ;;  %v1936_v55 = vmax.f32 %v1924_v51, 0.0  ;;  %vm413_vm4 = vcmp.eq.f32.partialorder %v1916_v48, inf }
 0x12c   : > { %1586 = vrsqrt.f32 %v1919_v49  ;;  %v1939_v56 = vmax.f32 %v1927_v52, 0.0  ;;  %v1942_v57 = vmax.f32 %v1929_v53, 0.0  ;;  %vm415_vm5 = vcmp.eq.f32.partialorder %v1916_v48, 0.0 }
 0x12d   : > { %1588 = vrsqrt.f32 %v1933_v54  ;;  %v416_v3 = vand.u32 2147483648, %v1916_v48  ;;  %vm469_vm6 = vcmp.eq.f32.partialorder %v1919_v49, inf  ;;  %vm471_vm7 = vcmp.eq.f32.partialorder %v1919_v49, 0.0 }
 0x12e   : > { %v1944_v58 = vpop.f32.mrb[4].mxu0  ;;  %v1946_v59 = vpop.f32.mrb[4].mxu1  ;;  %1590 = vrsqrt.f32 %v1936_v55  ;;  %v472_v10 = vand.u32 2147483648, %v1919_v49  ;;  %vm434_vm8 = vcmp.eq.f32.partialorder %v1933_v54, inf  ;;  %vm436_vm9 = vcmp.eq.f32.partialorder %v1933_v54, 0.0 }
 0x12f   : > { %v1949_v60 = vpop.f32.mrb[5].mxu0  ;;  %v1951_v61 = vpop.f32.mrb[5].mxu1  ;;  %1592 = vrsqrt.f32 %v1939_v56  ;;  %v1968_v4 = vmax.f32 %v1944_v58, 0.0  ;;  %v1971_v5 = vmax.f32 %v1946_v59, 0.0  ;;  %v437_v17 = vand.u32 2147483648, %v1933_v54 }
 0x130   : > { %1594 = vrsqrt.f32 %v1942_v57  ;;  %v1984_v13 = vmax.f32 %v1949_v60, 0.0  ;;  %v1998_v21 = vmax.f32 %v1951_v61, 0.0  ;;  %vm490_vm10 = vcmp.eq.f32.partialorder %v1936_v55, inf }
 0x131   : > { %1596 = vrsqrt.f32 %v1968_v4  ;;  %vm492_vm11 = vcmp.eq.f32.partialorder %v1936_v55, 0.0  ;;  %v493_v31 = vand.u32 2147483648, %v1936_v55  ;;  %vm427_vm12 = vcmp.eq.f32.partialorder %v1939_v56, inf }
 0x132   : > { %v1961_v0 = vpop.f32.mrb[6].mxu0  ;;  %v1963_v1 = vpop.f32.mrb[6].mxu1  ;;  %1598 = vrsqrt.f32 %v1971_v5  ;;  %vm429_vm13 = vcmp.eq.f32.partialorder %v1939_v56, 0.0  ;;  %v430_v38 = vand.u32 2147483648, %v1939_v56  ;;  %vm483_vm14 = vcmp.eq.f32.partialorder %v1942_v57, inf }
 0x133   : > { %v1581_v2 = vpop.eup %1580  ;;  %v1973_v6 = vpop.f32.mrb[7].mxu0  ;;  %v2009_v24 = vmax.f32 %v1961_v0, 0.0  ;;  %1600 = vrsqrt.f32 %v1984_v13  ;;  %v2031_v34 = vmax.f32 %v1963_v1, 0.0  ;;  %vm485_vm15 = vcmp.eq.f32.partialorder %v1942_v57, 0.0 }
 0x134   : > { %v1975_v7 = vpop.f32.mrb[7].mxu1  ;;  %v1583_v8 = vpop.eup %1582  ;;  %v419_v9 = vmul.f32 %v1581_v2, %v396_v44  ;;  %1602 = vrsqrt.f32 %v1998_v21 }
 0x135   : > { %v1585_v11 = vpop.eup %1584  ;;  %v475_v12 = vmul.f32 %v1583_v8, %v1909_v45  ;;  %1604 = vrsqrt.f32 %v2009_v24  ;;  %v451_v8 = vand.u32 2147483648, %v1968_v4 }
 0x136   : > { %v1587_v14 = vpop.eup %1586  ;;  %v421_v15 = vsel %vm420_vm0, %v396_v44, %v419_v9  ;;  %v412_v16 = vmul.f32 %v1585_v11, %v1916_v48  ;;  %v2048_v44 = vmax.f32 %v1973_v6, 0.0  ;;  %1606 = vrsqrt.f32 %v2031_v34 }
 0x137   : > { %v1991_v18 = vsel %vm422_vm1, %v423_v62, %v421_v15  ;;  %v477_v19 = vsel %vm476_vm2, %v1909_v45, %v475_v12  ;;  %v468_v20 = vmul.f32 %v1587_v14, %v1919_v49  ;;  %v1589_v25 = vpop.eup %1588  ;;  %vm448_vm0 = vcmp.eq.f32.partialorder %v1968_v4, inf }
 0x138   : > { %v2002_v22 = vsel %vm478_vm3, %v479_v63, %v477_v19  ;;  %v414_v23 = vsel %vm413_vm4, %v1916_v48, %v412_v16  ;;  %v1591_v28 = vpop.eup %1590  ;;  %v433_v30 = vmul.f32 %v1589_v25, %v1933_v54  ;;  %vm450_vm1 = vcmp.eq.f32.partialorder %v1968_v4, 0.0  ;;  %530 = vst [vmem:[%s2122_s17 + $0x8] sm:$0xff] (!%p1899_p11), %v1991_v18 }
 0x139   : > { %v2013_v26 = vsel %vm415_vm5, %v416_v3, %v414_v23  ;;  %v470_v27 = vsel %vm469_vm6, %v1919_v49, %v468_v20  ;;  %v1593_v32 = vpop.eup %1592  ;;  %v489_v33 = vmul.f32 %v1591_v28, %v1936_v55  ;;  %v486_v49 = vand.u32 2147483648, %v1942_v57  ;;  %538 = vst [vmem:[%s2122_s17 + $0x48] sm:$0xff] (!%p1899_p11), %v2002_v22 }
 0x13a   : > { %v2022_v29 = vsel %vm471_vm7, %v472_v10, %v470_v27  ;;  %v1595_v35 = vpop.eup %1594  ;;  %v435_v36 = vsel %vm434_vm8, %v1933_v54, %v433_v30  ;;  %v426_v37 = vmul.f32 %v1593_v32, %v1939_v56  ;;  %1608 = vrsqrt.f32 %v2048_v44  ;;  %529 = vst [vmem:[%s2122_s17] sm:$0xff] (!%p1899_p11), %v2013_v26 }
 0x13b   : > { %v2041_v39 = vsel %vm436_vm9, %v437_v17, %v435_v36  ;;  %v491_v40 = vsel %vm490_vm10, %v1936_v55, %v489_v33  ;;  %v482_v41 = vmul.f32 %v1595_v35, %v1942_v57  ;;  %v1597_v54 = vpop.eup %1596  ;;  %vm504_vm2 = vcmp.eq.f32.partialorder %v1971_v5, inf  ;;  %537 = vst [vmem:[%s2122_s17 + $0x40] sm:$0xff] (!%p1899_p11), %v2022_v29 }
 0x13c   : > { %v2052_v45 = vsel %vm492_vm11, %v493_v31, %v491_v40  ;;  %v428_v48 = vsel %vm427_vm12, %v1939_v56, %v426_v37  ;;  %v1599_v55 = vpop.eup %1598  ;;  %v447_v3 = vmul.f32 %v1597_v54, %v1968_v4  ;;  %v409_v10 = vmax.f32 %v1975_v7, 0.0  ;;  %532 = vst [vmem:[%s2122_s17 + $0x18] sm:$0xff] (!%p1899_p11), %v2041_v39 }
 0x13d   : > { %v2061_v62 = vsel %vm429_vm13, %v430_v38, %v428_v48  ;;  %v484_v63 = vsel %vm483_vm14, %v1942_v57, %v482_v41  ;;  %v503_v56 = vmul.f32 %v1599_v55, %v1971_v5  ;;  %v507_v57 = vand.u32 2147483648, %v1971_v5  ;;  %v1601_v11 = vpop.eup %1600  ;;  %540 = vst [vmem:[%s2122_s17 + $0x58] sm:$0xff] (!%p1899_p11), %v2052_v45 }
 0x13e   : > { %v2066_v2 = vsel %vm485_vm15, %v486_v49, %v484_v63  ;;  %v449_v9 = vsel %vm448_vm0, %v1968_v4, %v447_v3  ;;  %vm506_vm3 = vcmp.eq.f32.partialorder %v1971_v5, 0.0  ;;  %v440_v16 = vmul.f32 %v1601_v11, %v1984_v13  ;;  %v1603_v17 = vpop.eup %1602  ;;  %531 = vst [vmem:[%s2122_s17 + $0x10] sm:$0xff] (!%p1899_p11), %v2061_v62 }
 0x13f   : > { %v2078_v12 = vsel %vm450_vm1, %v451_v8, %v449_v9  ;;  %v505_v14 = vsel %vm504_vm2, %v1971_v5, %v503_v56  ;;  %1610 = vrsqrt.f32 %v409_v10  ;;  %vm441_vm4 = vcmp.eq.f32.partialorder %v1984_v13, inf  ;;  %v1605_v19 = vpop.eup %1604  ;;  %539 = vst [vmem:[%s2122_s17 + $0x50] sm:$0xff] (!%p1899_p11), %v2066_v2 }
 0x140   : > { %v2082_v15 = vsel %vm506_vm3, %v507_v57, %v505_v14  ;;  %v444_v4 = vand.u32 2147483648, %v1984_v13  ;;  %v442_v20 = vsel %vm441_vm4, %v1984_v13, %v440_v16  ;;  %vm443_vm5 = vcmp.eq.f32.partialorder %v1984_v13, 0.0  ;;  %v1607_v31 = vpop.eup %1606  ;;  %534 = vst [vmem:[%s2122_s17 + $0x28] sm:$0xff] (!%p1899_p11), %v2078_v12 }
 0x141   : > { %v496_v23 = vmul.f32 %v1603_v17, %v1998_v21  ;;  %vm497_vm6 = vcmp.eq.f32.partialorder %v1998_v21, inf  ;;  %v500_v5 = vand.u32 2147483648, %v1998_v21  ;;  %v461_v27 = vmul.f32 %v1605_v19, %v2009_v24  ;;  %542 = vst [vmem:[%s2122_s17 + $0x68] sm:$0xff] (!%p1899_p11), %v2082_v15 }
 0x142   : > { %v2090_v25 = vsel %vm443_vm5, %v444_v4, %v442_v20  ;;  %vm499_vm7 = vcmp.eq.f32.partialorder %v1998_v21, 0.0  ;;  %vm462_vm8 = vcmp.eq.f32.partialorder %v2009_v24, inf  ;;  %v465_v30 = vand.u32 2147483648, %v2009_v24 }
 0x143   : > { %v498_v28 = vsel %vm497_vm6, %v1998_v21, %v496_v23  ;;  %v463_v32 = vsel %vm462_vm8, %v2009_v24, %v461_v27  ;;  %vm464_vm9 = vcmp.eq.f32.partialorder %v2009_v24, 0.0  ;;  %v517_v35 = vmul.f32 %v1607_v31, %v2031_v34  ;;  %533 = vst [vmem:[%s2122_s17 + $0x20] sm:$0xff] (!%p1899_p11), %v2090_v25 }
 0x144   : > { %v2099_v13 = vsel %vm499_vm7, %v500_v5, %v498_v28  ;;  %v2103_v33 = vsel %vm464_vm9, %v465_v30, %v463_v32  ;;  %v1609_v36 = vpop.eup %1608  ;;  %vm518_vm10 = vcmp.eq.f32.partialorder %v2031_v34, inf  ;;  %v521_v21 = vand.u32 2147483648, %v2031_v34 }
 0x145   : > { %v519_v37 = vsel %vm518_vm10, %v2031_v34, %v517_v35  ;;  %vm520_vm11 = vcmp.eq.f32.partialorder %v2031_v34, 0.0  ;;  %v454_v38 = vmul.f32 %v1609_v36, %v2048_v44  ;;  %vm455_vm12 = vcmp.eq.f32.partialorder %v2048_v44, inf  ;;  %536 = vst [vmem:[%s2122_s17 + $0x38] sm:$0xff] (!%p1899_p11), %v2103_v33  ;;  %541 = vst [vmem:[%s2122_s17 + $0x60] sm:$0xff] (!%p1899_p11), %v2099_v13 }
 0x146   : > { %v2111_v40 = vsel %vm520_vm11, %v521_v21, %v519_v37  ;;  %v458_v24 = vand.u32 2147483648, %v2048_v44  ;;  %vm457_vm13 = vcmp.eq.f32.partialorder %v2048_v44, 0.0  ;;  %vm511_vm14 = vcmp.eq.f32.partialorder %v409_v10, inf }
 0x147   : > { %v456_v48 = vsel %vm455_vm12, %v2048_v44, %v454_v38  ;;  %v514_v63 = vand.u32 2147483648, %v409_v10  ;;  %vm513_vm15 = vcmp.eq.f32.partialorder %v409_v10, 0.0  ;;  %528 = sbr.rel (%p1899_p11) target bundleno = 335 (0x14f), region = 44  ;;  %544 = vst [vmem:[%s2122_s17 + $0x78] sm:$0xff] (!%p1899_p11), %v2111_v40 }
 0x148   : > { %v2117_v49 = vsel %vm457_vm13, %v458_v24, %v456_v48 }
 0x149   : > { %v1611_v41 = vpop.eup %1610  ;;  %535 = vst [vmem:[%s2122_s17 + $0x30] sm:$0xff] (!%p1899_p11), %v2117_v49 }
 0x14a   : > { %v510_v54 = vmul.f32 %v1611_v41, %v409_v10 }
 0x14c   : > { %v512_v55 = vsel %vm511_vm14, %v409_v10, %v510_v54 }
 0x14d   : > { %v2119_v34 = vsel %vm513_vm15, %v514_v63, %v512_v55 }
 0x14e   : > { %543 = vst [vmem:[%s2122_s17 + $0x70] sm:$0xff] %v2119_v34 }
 0x14f PF: > { %p545_p12 = scmp.ge.s32.totalorder %s1682_s22, 1 }
 0x151   : > { %p546_p13 = pnand %p545_p12, %p523_p9 }
 0x152   : > { %v550_v44 = vlaneseq (!%p546_p13)  ;;  %s1237_s19 = sshll.u32 (!%p546_p13), %s1686_s23, 7  ;;  %s1238_s18 = sadd.s32 (!%p546_p13), 4294967295, %s1682_s22  ;;  %v2168_v57 = vstv (!%p546_p13), %s1893_s15 }
 0x153   : > { %549 = sbr.rel (%p546_p13) target bundleno = 362 (0x16a), region = 48  ;;  %v2165_v3 = vstv (!%p546_p13), %s1237_s19  ;;  %s1239_s28 = sshll.u32 (!%p546_p13), %s1238_s18, 7 }
 0x154   : > { %v551_v8 = vshrl.u32 (!%p546_p13), %v550_v44, 7  ;;  %v586_v56 = vand.u32 (!%p546_p13), 127, %v550_v44  ;;  %v589_v9 = vstv (!%p546_p13), %s1239_s28 }
 0x156   : > { %v569_v10 = vadd.s32 (!%p546_p13), %v2165_v3, %v551_v8  ;;  %v2171_v11 = vadd.s32 (!%p546_p13), %v589_v9, %v586_v56  ;;  %v552_v14 = vadd.s32 (!%p546_p13), 8, %v551_v8  ;;  %v553_v16 = vadd.s32 (!%p546_p13), 16, %v551_v8 }
 0x157   : > { %v554_v17 = vadd.s32 (!%p546_p13), 24, %v551_v8  ;;  %v555_v4 = vadd.s32 (!%p546_p13), 32, %v551_v8  ;;  %v556_v19 = vadd.s32 (!%p546_p13), 40, %v551_v8  ;;  %v557_v20 = vadd.s32 (!%p546_p13), 48, %v551_v8 }
 0x158   : > { %vm591_vm0 = vcmp.le.s32.totalorder (!%p546_p13), %v569_v10, %v2171_v11  ;;  %v570_v23 = vadd.s32 (!%p546_p13), %v2165_v3, %v552_v14  ;;  %v571_v5 = vadd.s32 (!%p546_p13), %v2165_v3, %v553_v16  ;;  %v558_v27 = vadd.s32 (!%p546_p13), 56, %v551_v8 }
 0x159   : > { %v608_v28 = vsel (!%p546_p13), %vm591_vm0, %v2013_v26, %v2168_v57  ;;  %v572_v30 = vadd.s32 (!%p546_p13), %v2165_v3, %v554_v17  ;;  %v573_v31 = vadd.s32 (!%p546_p13), %v2165_v3, %v555_v4  ;;  %v574_v32 = vadd.s32 (!%p546_p13), %v2165_v3, %v556_v19 }
 0x15a   : > { %624 = vst [vmem:[%s2122_s17] sm:$0xff] %v608_v28  ;;  %vm592_vm1 = vcmp.le.s32.totalorder %v570_v23, %v2171_v11  ;;  %vm593_vm2 = vcmp.le.s32.totalorder %v571_v5, %v2171_v11  ;;  %v575_v35 = vadd.s32 %v2165_v3, %v557_v20  ;;  %v576_v36 = vadd.s32 %v2165_v3, %v558_v27 }
 0x15b   : > { %v609_v21 = vsel %vm592_vm1, %v1991_v18, %v2168_v57  ;;  %v610_v37 = vsel %vm593_vm2, %v2061_v62, %v2168_v57  ;;  %vm594_vm3 = vcmp.le.s32.totalorder %v572_v30, %v2171_v11  ;;  %vm595_vm4 = vcmp.le.s32.totalorder %v573_v31, %v2171_v11 }
 0x15c   : > { %625 = vst [vmem:[%s2122_s17 + $0x8] sm:$0xff] %v609_v21  ;;  %626 = vst [vmem:[%s2122_s17 + $0x10] sm:$0xff] %v610_v37  ;;  %v611_v38 = vsel %vm594_vm3, %v2041_v39, %v2168_v57  ;;  %v612_v24 = vsel %vm595_vm4, %v2090_v25, %v2168_v57  ;;  %vm596_vm5 = vcmp.le.s32.totalorder %v574_v32, %v2171_v11  ;;  %v559_v54 = vadd.s32 64, %v551_v8 }
 0x15d   : > { %vm597_vm6 = vcmp.le.s32.totalorder %v575_v35, %v2171_v11  ;;  %627 = vst [vmem:[%s2122_s17 + $0x18] sm:$0xff] %v611_v38  ;;  %628 = vst [vmem:[%s2122_s17 + $0x20] sm:$0xff] %v612_v24  ;;  %v613_v41 = vsel %vm596_vm5, %v2078_v12, %v2168_v57  ;;  %vm598_vm7 = vcmp.le.s32.totalorder %v576_v36, %v2171_v11  ;;  %v560_v55 = vadd.s32 72, %v551_v8 }
 0x15e   : > { %v614_v48 = vsel %vm597_vm6, %v2117_v49, %v2168_v57  ;;  %629 = vst [vmem:[%s2122_s17 + $0x28] sm:$0xff] %v613_v41  ;;  %v615_v63 = vsel %vm598_vm7, %v2103_v33, %v2168_v57  ;;  %v561_v44 = vadd.s32 80, %v551_v8  ;;  %v562_v56 = vadd.s32 88, %v551_v8 }
 0x15f   : > { %630 = vst [vmem:[%s2122_s17 + $0x30] sm:$0xff] %v614_v48  ;;  %631 = vst [vmem:[%s2122_s17 + $0x38] sm:$0xff] %v615_v63  ;;  %v577_v9 = vadd.s32 %v2165_v3, %v559_v54  ;;  %v563_v10 = vadd.s32 96, %v551_v8  ;;  %v564_v14 = vadd.s32 104, %v551_v8  ;;  %v565_v16 = vadd.s32 112, %v551_v8 }
 0x160   : > { %v578_v17 = vadd.s32 %v2165_v3, %v560_v55  ;;  %v579_v4 = vadd.s32 %v2165_v3, %v561_v44  ;;  %v580_v19 = vadd.s32 %v2165_v3, %v562_v56  ;;  %v566_v20 = vadd.s32 120, %v551_v8 }
 0x161   : > { %vm599_vm8 = vcmp.le.s32.totalorder %v577_v9, %v2171_v11  ;;  %v581_v23 = vadd.s32 %v2165_v3, %v563_v10  ;;  %v582_v5 = vadd.s32 %v2165_v3, %v564_v14  ;;  %v583_v27 = vadd.s32 %v2165_v3, %v565_v16 }
 0x162   : > { %v616_v28 = vsel %vm599_vm8, %v2022_v29, %v2168_v57  ;;  %vm600_vm9 = vcmp.le.s32.totalorder %v578_v17, %v2171_v11  ;;  %vm601_vm10 = vcmp.le.s32.totalorder %v579_v4, %v2171_v11  ;;  %vm602_vm11 = vcmp.le.s32.totalorder %v580_v19, %v2171_v11 }
 0x163   : > { %632 = vst [vmem:[%s2122_s17 + $0x40] sm:$0xff] %v616_v28  ;;  %v617_v8 = vsel %vm600_vm9, %v2002_v22, %v2168_v57  ;;  %v618_v30 = vsel %vm601_vm10, %v2066_v2, %v2168_v57  ;;  %v619_v31 = vsel %vm602_vm11, %v2052_v45, %v2168_v57  ;;  %vm603_vm12 = vcmp.le.s32.totalorder %v581_v23, %v2171_v11 }
 0x164   : > { %633 = vst [vmem:[%s2122_s17 + $0x48] sm:$0xff] %v617_v8  ;;  %634 = vst [vmem:[%s2122_s17 + $0x50] sm:$0xff] %v618_v30  ;;  %v620_v32 = vsel %vm603_vm12, %v2099_v13, %v2168_v57  ;;  %vm604_vm13 = vcmp.le.s32.totalorder %v582_v5, %v2171_v11  ;;  %vm605_vm14 = vcmp.le.s32.totalorder %v583_v27, %v2171_v11 }
 0x165   : > { %635 = vst [vmem:[%s2122_s17 + $0x58] sm:$0xff] %v619_v31  ;;  %v584_v35 = vadd.s32 %v2165_v3, %v566_v20  ;;  %636 = vst [vmem:[%s2122_s17 + $0x60] sm:$0xff] %v620_v32  ;;  %v621_v36 = vsel %vm604_vm13, %v2082_v15, %v2168_v57  ;;  %v622_v21 = vsel %vm605_vm14, %v2119_v34, %v2168_v57 }
 0x166   : > { %637 = vst [vmem:[%s2122_s17 + $0x68] sm:$0xff] %v621_v36  ;;  %638 = vst [vmem:[%s2122_s17 + $0x70] sm:$0xff] %v622_v21 }
 0x167   : > { %vm606_vm15 = vcmp.le.s32.totalorder %v584_v35, %v2171_v11 }
 0x168   : > { %v623_v37 = vsel %vm606_vm15, %v2111_v40, %v2168_v57 }
 0x169   : > { %639 = vst [vmem:[%s2122_s17 + $0x78] sm:$0xff] %v623_v37 }
 0x16a PF: > { %p640_p0 = scmp.ge.s32.totalorder %s1686_s23, 1 }
 0x16c   : > { %p641_p1 = pnand %p640_p0, %p524_p10 }
 0x16d   : > { %v645_v3 = vlaneseq (!%p641_p1)  ;;  %s1240_s29 = sadd.s32 (!%p641_p1), 4294967295, %s1686_s23  ;;  %s1242_s6 = sshll.u32 (!%p641_p1), %s1682_s22, 7  ;;  %v2262_v41 = vstv (!%p641_p1), %s1893_s15 }
 0x16e   : > { %644 = sbr.rel (%p641_p1) target bundleno = 389 (0x185), region = 52  ;;  %s1241_s20 = sshll.u32 (!%p641_p1), %s1240_s29, 7  ;;  %v684_v11 = vstv (!%p641_p1), %s1242_s6 }
 0x16f   : > { %v646_v38 = vshrl.u32 (!%p641_p1), %v645_v3, 7  ;;  %v2259_v57 = vstv (!%p641_p1), %s1241_s20  ;;  %v682_v24 = vand.u32 (!%p641_p1), 127, %v645_v3 }
 0x171   : > { %v665_v48 = vadd.s32 (!%p641_p1), %v2259_v57, %v646_v38  ;;  %v2265_v54 = vadd.s32 (!%p641_p1), %v684_v11, %v682_v24  ;;  %v647_v63 = vadd.s32 (!%p641_p1), 8, %v646_v38  ;;  %v648_v55 = vadd.s32 (!%p641_p1), 16, %v646_v38 }
 0x172   : > { %v649_v44 = vadd.s32 (!%p641_p1), 24, %v646_v38  ;;  %v650_v56 = vadd.s32 (!%p641_p1), 32, %v646_v38  ;;  %v651_v9 = vadd.s32 (!%p641_p1), 40, %v646_v38  ;;  %v652_v10 = vadd.s32 (!%p641_p1), 48, %v646_v38 }
 0x173   : > { %vm686_vm0 = vcmp.ge.s32.totalorder (!%p641_p1), %v665_v48, %v2265_v54  ;;  %v666_v14 = vadd.s32 (!%p641_p1), %v2259_v57, %v647_v63  ;;  %v667_v16 = vadd.s32 (!%p641_p1), %v2259_v57, %v648_v55  ;;  %v653_v17 = vadd.s32 (!%p641_p1), 56, %v646_v38 }
 0x174   : > { %v703_v4 = vsel (!%p641_p1), %vm686_vm0, %v2013_v26, %v2262_v41  ;;  %v668_v19 = vadd.s32 (!%p641_p1), %v2259_v57, %v649_v44  ;;  %v669_v20 = vadd.s32 (!%p641_p1), %v2259_v57, %v650_v56  ;;  %v670_v23 = vadd.s32 (!%p641_p1), %v2259_v57, %v651_v9 }
 0x175   : > { %719 = vst [vmem:[%s2122_s17] sm:$0xff] %v703_v4  ;;  %vm687_vm1 = vcmp.ge.s32.totalorder %v666_v14, %v2265_v54  ;;  %vm688_vm2 = vcmp.ge.s32.totalorder %v667_v16, %v2265_v54  ;;  %v671_v5 = vadd.s32 %v2259_v57, %v652_v10  ;;  %v672_v27 = vadd.s32 %v2259_v57, %v653_v17 }
 0x176   : > { %v704_v26 = vsel %vm687_vm1, %v1991_v18, %v2262_v41  ;;  %v705_v28 = vsel %vm688_vm2, %v2061_v62, %v2262_v41  ;;  %vm689_vm3 = vcmp.ge.s32.totalorder %v668_v19, %v2265_v54  ;;  %vm690_vm4 = vcmp.ge.s32.totalorder %v669_v20, %v2265_v54 }
 0x177   : > { %720 = vst [vmem:[%s2122_s17 + $0x8] sm:$0xff] %v704_v26  ;;  %721 = vst [vmem:[%s2122_s17 + $0x10] sm:$0xff] %v705_v28  ;;  %v706_v8 = vsel %vm689_vm3, %v2041_v39, %v2262_v41  ;;  %v707_v30 = vsel %vm690_vm4, %v2090_v25, %v2262_v41  ;;  %vm691_vm5 = vcmp.ge.s32.totalorder %v670_v23, %v2265_v54  ;;  %v654_v31 = vadd.s32 64, %v646_v38 }
 0x178   : > { %vm692_vm6 = vcmp.ge.s32.totalorder %v671_v5, %v2265_v54  ;;  %722 = vst [vmem:[%s2122_s17 + $0x18] sm:$0xff] %v706_v8  ;;  %723 = vst [vmem:[%s2122_s17 + $0x20] sm:$0xff] %v707_v30  ;;  %v708_v18 = vsel %vm691_vm5, %v2078_v12, %v2262_v41  ;;  %vm693_vm7 = vcmp.ge.s32.totalorder %v672_v27, %v2265_v54  ;;  %v655_v25 = vadd.s32 72, %v646_v38 }
 0x179   : > { %v709_v62 = vsel %vm692_vm6, %v2117_v49, %v2262_v41  ;;  %724 = vst [vmem:[%s2122_s17 + $0x28] sm:$0xff] %v708_v18  ;;  %v710_v39 = vsel %vm693_vm7, %v2103_v33, %v2262_v41  ;;  %v656_v32 = vadd.s32 80, %v646_v38  ;;  %v657_v35 = vadd.s32 88, %v646_v38 }
 0x17a   : > { %725 = vst [vmem:[%s2122_s17 + $0x30] sm:$0xff] %v709_v62  ;;  %726 = vst [vmem:[%s2122_s17 + $0x38] sm:$0xff] %v710_v39  ;;  %v673_v36 = vadd.s32 %v2259_v57, %v654_v31  ;;  %v658_v21 = vadd.s32 96, %v646_v38  ;;  %v659_v12 = vadd.s32 104, %v646_v38  ;;  %v660_v37 = vadd.s32 112, %v646_v38 }
 0x17b   : > { %v674_v49 = vadd.s32 %v2259_v57, %v655_v25  ;;  %v675_v3 = vadd.s32 %v2259_v57, %v656_v32  ;;  %v676_v11 = vadd.s32 %v2259_v57, %v657_v35  ;;  %v661_v24 = vadd.s32 120, %v646_v38 }
 0x17c   : > { %vm694_vm8 = vcmp.ge.s32.totalorder %v673_v36, %v2265_v54  ;;  %v677_v33 = vadd.s32 %v2259_v57, %v658_v21  ;;  %v678_v48 = vadd.s32 %v2259_v57, %v659_v12  ;;  %v679_v63 = vadd.s32 %v2259_v57, %v660_v37 }
 0x17d   : > { %v711_v55 = vsel %vm694_vm8, %v2022_v29, %v2262_v41  ;;  %vm695_vm9 = vcmp.ge.s32.totalorder %v674_v49, %v2265_v54  ;;  %vm696_vm10 = vcmp.ge.s32.totalorder %v675_v3, %v2265_v54  ;;  %vm697_vm11 = vcmp.ge.s32.totalorder %v676_v11, %v2265_v54 }
 0x17e   : > { %727 = vst [vmem:[%s2122_s17 + $0x40] sm:$0xff] %v711_v55  ;;  %v712_v38 = vsel %vm695_vm9, %v2002_v22, %v2262_v41  ;;  %v713_v44 = vsel %vm696_vm10, %v2066_v2, %v2262_v41  ;;  %v714_v56 = vsel %vm697_vm11, %v2052_v45, %v2262_v41  ;;  %vm698_vm12 = vcmp.ge.s32.totalorder %v677_v33, %v2265_v54 }
 0x17f   : > { %728 = vst [vmem:[%s2122_s17 + $0x48] sm:$0xff] %v712_v38  ;;  %729 = vst [vmem:[%s2122_s17 + $0x50] sm:$0xff] %v713_v44  ;;  %v715_v29 = vsel %vm698_vm12, %v2099_v13, %v2262_v41  ;;  %vm699_vm13 = vcmp.ge.s32.totalorder %v678_v48, %v2265_v54  ;;  %vm700_vm14 = vcmp.ge.s32.totalorder %v679_v63, %v2265_v54 }
 0x180   : > { %730 = vst [vmem:[%s2122_s17 + $0x58] sm:$0xff] %v714_v56  ;;  %v680_v22 = vadd.s32 %v2259_v57, %v661_v24  ;;  %731 = vst [vmem:[%s2122_s17 + $0x60] sm:$0xff] %v715_v29  ;;  %v716_v2 = vsel %vm699_vm13, %v2082_v15, %v2262_v41  ;;  %v717_v45 = vsel %vm700_vm14, %v2119_v34, %v2262_v41 }
 0x181   : > { %732 = vst [vmem:[%s2122_s17 + $0x68] sm:$0xff] %v716_v2  ;;  %733 = vst [vmem:[%s2122_s17 + $0x70] sm:$0xff] %v717_v45 }
 0x182   : > { %vm701_vm15 = vcmp.ge.s32.totalorder %v680_v22, %v2265_v54 }
 0x183   : > { %v718_v13 = vsel %vm701_vm15, %v2111_v40, %v2262_v41 }
 0x184   : > { %734 = vst [vmem:[%s2122_s17 + $0x78] sm:$0xff] %v718_v13 }
 0x185 PF: > { %p735_p2 = pnand %p640_p0, %p545_p12 }
 0x186   : > { %v755_v15 = vld [vmem:[%s2684_s4] sm:$0xff] (!%p735_p2)  ;;  %v756_v34 = vld [vmem:[%s2684_s4 + $0x8] sm:$0xff] (!%p735_p2)  ;;  %v757_v40 = vld [vmem:[%s2684_s4 + $0x10] sm:$0xff] (!%p735_p2) }
 0x187   : > { %738 = sbr.rel (%p735_p2) target bundleno = 716 (0x2cc), region = 56  ;;  %v1458_v57 = vpack.c.bf16 (!%p735_p2), %v756_v34, %v755_v15  ;;  %v758_v41 = vld [vmem:[%s2684_s4 + $0x18] sm:$0xff] (!%p735_p2)  ;;  %v739_v9 = vld [vmem:[%s2683_s3] sm:$0xff] (!%p735_p2)  ;;  %v760_v16 = vld [vmem:[%s2684_s4 + $0x28] sm:$0xff] (!%p735_p2) }
 0x188   : > { %v1462_v54 = vpack.c.bf16 (!%p735_p2), %v758_v41, %v757_v40  ;;  %v747_v10 = vld [vmem:[%s2683_s3 + $0x40] sm:$0xff] (!%p735_p2)  ;;  %1402 = vmatprep.mubr.f32.mxu0 (!%p735_p2), %v739_v9  ;;  %v761_v4 = vld [vmem:[%s2684_s4 + $0x30] sm:$0xff] (!%p735_p2)  ;;  %v762_v19 = vld [vmem:[%s2684_s4 + $0x38] sm:$0xff] (!%p735_p2) }
 0x189   : > { %1459 = vmatprep.subr.bf16.mxu0 (!%p735_p2), %v1458_v57  ;;  %1506 = vmatprep.subr.bf16.mxu1 (!%p735_p2), %v1458_v57  ;;  %v759_v14 = vld [vmem:[%s2684_s4 + $0x20] sm:$0xff] (!%p735_p2)  ;;  %v1470_v20 = vpack.c.bf16 (!%p735_p2), %v762_v19, %v761_v4  ;;  %v764_v5 = vld [vmem:[%s2684_s4 + $0x48] sm:$0xff] (!%p735_p2)  ;;  %v765_v26 = vld [vmem:[%s2684_s4 + $0x50] sm:$0xff] (!%p735_p2) }
 0x18a   : > { %1461 = vmatpush3.bf16.xpose.msra.mxu0 (!%p735_p2), %v1458_v57  ;;  %1514 = vmatpush3.bf16.xpose.msra.mxu1 (!%p735_p2), %v1458_v57  ;;  %v1466_v17 = vpack.c.bf16 (!%p735_p2), %v760_v16, %v759_v14  ;;  %v763_v23 = vld [vmem:[%s2684_s4 + $0x40] sm:$0xff] (!%p735_p2)  ;;  %v766_v28 = vld [vmem:[%s2684_s4 + $0x58] sm:$0xff] (!%p735_p2)  ;;  %v768_v18 = vld [vmem:[%s2684_s4 + $0x68] sm:$0xff] (!%p735_p2) }
 0x18b   : > { %1463 = vmatprep.subr.bf16.mxu0 (!%p735_p2), %v1462_v54  ;;  %1507 = vmatprep.subr.bf16.mxu1 (!%p735_p2), %v1462_v54  ;;  %v1474_v27 = vpack.c.bf16 (!%p735_p2), %v764_v5, %v763_v23  ;;  %v1478_v8 = vpack.c.bf16 (!%p735_p2), %v766_v28, %v765_v26  ;;  %v767_v30 = vld [vmem:[%s2684_s4 + $0x60] sm:$0xff] (!%p735_p2)  ;;  %v769_v31 = vld [vmem:[%s2684_s4 + $0x70] sm:$0xff] (!%p735_p2)  ;;  %v770_v39 = vld [vmem:[%s2684_s4 + $0x78] sm:$0xff] (!%p735_p2) }
 0x18c   : > { %1414 = vmatprep.mubr.f32.mxu1 (!%p735_p2), %v747_v10  ;;  %v1482_v62 = vpack.c.bf16 (!%p735_p2), %v768_v18, %v767_v30  ;;  %v1486_v25 = vpack.c.bf16 (!%p735_p2), %v770_v39, %v769_v31  ;;  %v740_v32 = vld [vmem:[%s2683_s3 + $0x8] sm:$0xff] (!%p735_p2)  ;;  %v741_v36 = vld [vmem:[%s2683_s3 + $0x10] sm:$0xff] (!%p735_p2)  ;;  %v742_v12 = vld [vmem:[%s2683_s3 + $0x18] sm:$0xff] (!%p735_p2) }
 0x18d   : > { %v748_v35 = vld [vmem:[%s2683_s3 + $0x48] sm:$0xff] (!%p735_p2)  ;;  %v749_v21 = vld [vmem:[%s2683_s3 + $0x50] sm:$0xff] (!%p735_p2)  ;;  %v750_v37 = vld [vmem:[%s2683_s3 + $0x58] sm:$0xff] (!%p735_p2) }
 0x18e   : > { %v743_v49 = vld [vmem:[%s2683_s3 + $0x20] sm:$0xff]  ;;  %v744_v11 = vld [vmem:[%s2683_s3 + $0x28] sm:$0xff]  ;;  %v745_v33 = vld [vmem:[%s2683_s3 + $0x30] sm:$0xff] }
 0x18f   : > { %v751_v3 = vld [vmem:[%s2683_s3 + $0x60] sm:$0xff]  ;;  %v752_v24 = vld [vmem:[%s2683_s3 + $0x68] sm:$0xff]  ;;  %v753_v48 = vld [vmem:[%s2683_s3 + $0x70] sm:$0xff] }
 0x190   : > { %v746_v63 = vld [vmem:[%s2683_s3 + $0x38] sm:$0xff] }
 0x191   : > { %v754_v55 = vld [vmem:[%s2683_s3 + $0x78] sm:$0xff] }
 0x192   : > { %1465 = vmatpush3.bf16.xpose.msra.mxu0 %v1462_v54  ;;  %1515 = vmatpush3.bf16.xpose.msra.mxu1 %v1462_v54 }
 0x193   : > { %1467 = vmatprep.subr.bf16.mxu0 %v1466_v17  ;;  %1508 = vmatprep.subr.bf16.mxu1 %v1466_v17 }
 0x19a   : > { %1469 = vmatpush3.bf16.xpose.msra.mxu0 %v1466_v17  ;;  %1516 = vmatpush3.bf16.xpose.msra.mxu1 %v1466_v17 }
 0x19b   : > { %1471 = vmatprep.subr.bf16.mxu0 %v1470_v20  ;;  %1509 = vmatprep.subr.bf16.mxu1 %v1470_v20 }
 0x1a2   : > { %1473 = vmatpush3.bf16.xpose.msra.mxu0 %v1470_v20  ;;  %1517 = vmatpush3.bf16.xpose.msra.mxu1 %v1470_v20 }
 0x1a3   : > { %1475 = vmatprep.subr.bf16.mxu0 %v1474_v27  ;;  %1510 = vmatprep.subr.bf16.mxu1 %v1474_v27 }
 0x1aa   : > { %1477 = vmatpush3.bf16.xpose.msra.mxu0 %v1474_v27  ;;  %1518 = vmatpush3.bf16.xpose.msra.mxu1 %v1474_v27 }
 0x1ab   : > { %1479 = vmatprep.subr.bf16.mxu0 %v1478_v8  ;;  %1511 = vmatprep.subr.bf16.mxu1 %v1478_v8 }
 0x1b2   : > { %1481 = vmatpush3.bf16.xpose.msra.mxu0 %v1478_v8  ;;  %1519 = vmatpush3.bf16.xpose.msra.mxu1 %v1478_v8 }
 0x1b3   : > { %1483 = vmatprep.subr.bf16.mxu0 %v1482_v62  ;;  %1512 = vmatprep.subr.bf16.mxu1 %v1482_v62 }
 0x1ba   : > { %1485 = vmatpush3.bf16.xpose.msra.mxu0 %v1482_v62  ;;  %1520 = vmatpush3.bf16.xpose.msra.mxu1 %v1482_v62 }
 0x1bb   : > { %1487 = vmatprep.subr.bf16.mxu0 %v1486_v25  ;;  %1513 = vmatprep.subr.bf16.mxu1 %v1486_v25 }
 0x1c2   : > { %1489 = vmatpush3.bf16.xpose.msra.mxu0 %v1486_v25  ;;  %1521 = vmatpush3.bf16.xpose.msra.mxu1 %v1486_v25 }
 0x1c9   : > { %1403 = vmatmul.mubr.f32.vlgmr.msra.gmra.mrb[0].mxu0 %v740_v32  ;;  %1415 = vmatmul.mubr.f32.vlgmr.msra.gmra.mrb[0].mxu1 %v748_v35 }
 0x1ca   : > { %1405 = vmatprep.mubr.f32.mxu0 %v741_v36  ;;  %1417 = vmatprep.mubr.f32.mxu1 %v749_v21 }
 0x1cd   : > { %1406 = vmatmul.mubr.f32.gmra.mrb[2].mxu0 %v742_v12  ;;  %1418 = vmatmul.mubr.f32.gmra.mrb[2].mxu1 %v750_v37 }
 0x1ce   : > { %1408 = vmatprep.mubr.f32.mxu0 %v743_v49  ;;  %1420 = vmatprep.mubr.f32.mxu1 %v751_v3 }
 0x1d1   : > { %1409 = vmatmul.mubr.f32.gmra.mrb[4].mxu0 %v744_v11  ;;  %1421 = vmatmul.mubr.f32.gmra.mrb[4].mxu1 %v752_v24 }
 0x1d2   : > { %1411 = vmatprep.mubr.f32.mxu0 %v745_v33  ;;  %1423 = vmatprep.mubr.f32.mxu1 %v753_v48 }
 0x1d5   : > { %1412 = vmatmul.mubr.f32.gmra.mrb[6].mxu0 %v746_v63  ;;  %1424 = vmatmul.mubr.f32.gmra.mrb[6].mxu1 %v754_v55 }
 0x29c   : > { %v1404_v38 = vpop.f32.mrb[0].mxu0  ;;  %v1416_v44 = vpop.f32.mrb[0].mxu1 }
 0x29d   : > { %v917_v56 = vmin.f32 %v1903_v42, %v1404_v38  ;;  %v925_v29 = vmin.f32 %v1905_v43, %v1416_v44  ;;  %v837_v22 = vpop.f32.mrb[1].mxu0  ;;  %v877_v2 = vpop.f32.mrb[1].mxu1 }
 0x29e   : > { %v916_v45 = vmin.f32 %v1911_v46, %v837_v22  ;;  %v924_v13 = vmin.f32 %v1913_v47, %v877_v2 }
 0x29f   : > { %v2450_v15 = vmax.f32 %v917_v56, 0.0  ;;  %v2452_v34 = vmax.f32 %v925_v29, 0.0 }
 0x2a0   : > { %v2454_v40 = vmax.f32 %v916_v45, 0.0  ;;  %v2456_v57 = vmax.f32 %v924_v13, 0.0  ;;  %v1407_v41 = vpop.f32.mrb[2].mxu0  ;;  %v1419_v54 = vpop.f32.mrb[2].mxu1 }
 0x2a1   : > { %1612 = vrsqrt.f32 %v2450_v15  ;;  %v847_v42 = vpop.f32.mrb[3].mxu0  ;;  %v887_v43 = vpop.f32.mrb[3].mxu1  ;;  %v919_v9 = vmin.f32 %v1922_v50, %v1407_v41  ;;  %v927_v10 = vmin.f32 %v1924_v51, %v1419_v54  ;;  %vm957_vm0 = vcmp.eq.f32.partialorder %v2450_v15, inf }
 0x2a2   : > { %1614 = vrsqrt.f32 %v2452_v34  ;;  %v918_v14 = vmin.f32 %v1927_v52, %v847_v42  ;;  %v926_v16 = vmin.f32 %v1929_v53, %v887_v43  ;;  %vm959_vm1 = vcmp.eq.f32.partialorder %v2450_v15, 0.0 }
 0x2a3   : > { %1616 = vrsqrt.f32 %v2454_v40  ;;  %v2468_v20 = vmax.f32 %v919_v9, 0.0  ;;  %v2470_v23 = vmax.f32 %v927_v10, 0.0  ;;  %v960_v51 = vand.u32 2147483648, %v2450_v15 }
 0x2a4   : > { %1618 = vrsqrt.f32 %v2456_v57  ;;  %v1410_v46 = vpop.f32.mrb[4].mxu0  ;;  %v1422_v47 = vpop.f32.mrb[4].mxu1  ;;  %v2472_v5 = vmax.f32 %v918_v14, 0.0  ;;  %vm1013_vm2 = vcmp.eq.f32.partialorder %v2452_v34, inf  ;;  %v2478_v52 = vmax.f32 %v926_v16, 0.0 }
 0x2a5   : > { %v857_v17 = vpop.f32.mrb[5].mxu0  ;;  %v897_v4 = vpop.f32.mrb[5].mxu1  ;;  %v921_v19 = vmin.f32 %v1944_v58, %v1410_v46  ;;  %v929_v50 = vmin.f32 %v1946_v59, %v1422_v47  ;;  %vm1015_vm3 = vcmp.eq.f32.partialorder %v2452_v34, 0.0  ;;  %1620 = vrsqrt.f32 %v2468_v20 }
 0x2a6   : > { %v920_v59 = vmin.f32 %v1949_v60, %v857_v17  ;;  %v1016_v8 = vand.u32 2147483648, %v2452_v34  ;;  %vm950_vm4 = vcmp.eq.f32.partialorder %v2454_v40, inf  ;;  %1622 = vrsqrt.f32 %v2470_v23 }
 0x2a7   : > { %v2486_v58 = vmax.f32 %v921_v19, 0.0  ;;  %v928_v30 = vmin.f32 %v1951_v61, %v897_v4  ;;  %vm952_vm5 = vcmp.eq.f32.partialorder %v2454_v40, 0.0  ;;  %v953_v62 = vand.u32 2147483648, %v2454_v40 }
 0x2a8   : > { %v2480_v53 = vpop.f32.mrb[6].mxu0  ;;  %v2482_v27 = vpop.f32.mrb[6].mxu1  ;;  %1624 = vrsqrt.f32 %v2472_v5  ;;  %v2500_v60 = vmax.f32 %v929_v50, 0.0  ;;  %vm1006_vm6 = vcmp.eq.f32.partialorder %v2456_v57, inf  ;;  %vm1008_vm7 = vcmp.eq.f32.partialorder %v2456_v57, 0.0 }
 0x2a9   : > { %v2489_v26 = vpop.f32.mrb[7].mxu0  ;;  %v2491_v28 = vpop.f32.mrb[7].mxu1  ;;  %1626 = vrsqrt.f32 %v2478_v52  ;;  %v1009_v32 = vand.u32 2147483648, %v2456_v57  ;;  %v2509_v35 = vmax.f32 %v920_v59, 0.0  ;;  %vm971_vm8 = vcmp.eq.f32.partialorder %v2468_v20, inf }
 0x2aa   : > { %1628 = vrsqrt.f32 %v2486_v58  ;;  %v2516_v37 = vmax.f32 %v928_v30, 0.0  ;;  %vm973_vm9 = vcmp.eq.f32.partialorder %v2468_v20, 0.0  ;;  %v974_v48 = vand.u32 2147483648, %v2468_v20 }
 0x2ab   : > { %v1613_v18 = vpop.eup %1612  ;;  %1630 = vrsqrt.f32 %v2500_v60  ;;  %vm1027_vm10 = vcmp.eq.f32.partialorder %v2470_v23, inf  ;;  %vm1029_vm11 = vcmp.eq.f32.partialorder %v2470_v23, 0.0  ;;  %v1030_v44 = vand.u32 2147483648, %v2470_v23 }
 0x2ac   : > { %v1615_v31 = vpop.eup %1614  ;;  %v956_v39 = vmul.f32 %v1613_v18, %v2450_v15  ;;  %1632 = vrsqrt.f32 %v2509_v35  ;;  %vm964_vm12 = vcmp.eq.f32.partialorder %v2472_v5, inf  ;;  %vm966_vm13 = vcmp.eq.f32.partialorder %v2472_v5, 0.0 }
 0x2ad   : > { %v1617_v61 = vpop.eup %1616  ;;  %v1012_v25 = vmul.f32 %v1615_v31, %v2452_v34  ;;  %v967_v29 = vand.u32 2147483648, %v2472_v5  ;;  %vm1020_vm14 = vcmp.eq.f32.partialorder %v2478_v52, inf  ;;  %1634 = vrsqrt.f32 %v2516_v37 }
 0x2ae   : > { %v1619_v36 = vpop.eup %1618  ;;  %v958_v21 = vsel %vm957_vm0, %v2450_v15, %v956_v39  ;;  %v949_v12 = vmul.f32 %v1617_v61, %v2454_v40  ;;  %v923_v45 = vmin.f32 %v1961_v0, %v2480_v53  ;;  %v931_v13 = vmin.f32 %v1963_v1, %v2482_v27 }
 0x2af   : > { %v961_v49 = vsel %vm959_vm1, %v960_v51, %v958_v21  ;;  %v1014_v3 = vsel %vm1013_vm2, %v2452_v34, %v1012_v25  ;;  %v1005_v11 = vmul.f32 %v1619_v36, %v2456_v57  ;;  %v1621_v56 = vpop.eup %1620  ;;  %v922_v15 = vmin.f32 %v1973_v6, %v2489_v26 }
 0x2b0   : > { %1061 = vst [vmem:[%s2122_s17 + $0x8] sm:$0xff] %v961_v49  ;;  %v1017_v24 = vsel %vm1015_vm3, %v1016_v8, %v1014_v3  ;;  %v951_v33 = vsel %vm950_vm4, %v2454_v40, %v949_v12  ;;  %v1623_v22 = vpop.eup %1622  ;;  %v970_v2 = vmul.f32 %v1621_v56, %v2468_v20  ;;  %vm1022_vm15 = vcmp.eq.f32.partialorder %v2478_v52, 0.0 }
 0x2b1   : > { %1069 = vst [vmem:[%s2122_s17 + $0x48] sm:$0xff] %v1017_v24  ;;  %v954_v63 = vsel %vm952_vm5, %v953_v62, %v951_v33  ;;  %v1007_v55 = vsel %vm1006_vm6, %v2456_v57, %v1005_v11  ;;  %v1026_v40 = vmul.f32 %v1623_v22, %v2470_v23  ;;  %v1023_v57 = vand.u32 2147483648, %v2478_v52 }
 0x2b2   : > { %1060 = vst [vmem:[%s2122_s17] sm:$0xff] %v954_v63  ;;  %v1010_v38 = vsel %vm1008_vm7, %v1009_v32, %v1007_v55  ;;  %v1625_v34 = vpop.eup %1624  ;;  %vm985_vm0 = vcmp.eq.f32.partialorder %v2486_v58, inf  ;;  %v972_v0 = vsel %vm971_vm8, %v2468_v20, %v970_v2  ;;  %v939_v54 = vmax.f32 %v923_v45, 0.0 }
 0x2b3   : > { %1068 = vst [vmem:[%s2122_s17 + $0x40] sm:$0xff] %v1010_v38  ;;  %v1627_v41 = vpop.eup %1626  ;;  %v963_v1 = vmul.f32 %v1625_v34, %v2472_v5  ;;  %v2567_v6 = vmax.f32 %v931_v13, 0.0  ;;  %v975_v43 = vsel %vm973_vm9, %v974_v48, %v972_v0  ;;  %v1028_v46 = vsel %vm1027_vm10, %v2470_v23, %v1026_v40 }
 0x2b4   : > { %v1629_v42 = vpop.eup %1628  ;;  %v1019_v47 = vmul.f32 %v1627_v41, %v2478_v52  ;;  %v2575_v9 = vmax.f32 %v922_v15, 0.0  ;;  %1063 = vst [vmem:[%s2122_s17 + $0x18] sm:$0xff] %v975_v43  ;;  %v1031_v10 = vsel %vm1029_vm11, %v1030_v44, %v1028_v46  ;;  %1636 = vrsqrt.f32 %v939_v54 }
 0x2b5   : > { %v965_v14 = vsel %vm964_vm12, %v2472_v5, %v963_v1  ;;  %v984_v16 = vmul.f32 %v1629_v42, %v2486_v58  ;;  %v1631_v17 = vpop.eup %1630  ;;  %1071 = vst [vmem:[%s2122_s17 + $0x58] sm:$0xff] %v1031_v10  ;;  %vm987_vm1 = vcmp.eq.f32.partialorder %v2486_v58, 0.0  ;;  %v988_v20 = vand.u32 2147483648, %v2486_v58 }
 0x2b6   : > { %v968_v4 = vsel %vm966_vm13, %v967_v29, %v965_v14  ;;  %v1021_v19 = vsel %vm1020_vm14, %v2478_v52, %v1019_v47  ;;  %v1040_v5 = vmul.f32 %v1631_v17, %v2500_v60  ;;  %v930_v51 = vmin.f32 %v1975_v7, %v2491_v28  ;;  %v1633_v53 = vpop.eup %1632 }
 0x2b7   : > { %1062 = vst [vmem:[%s2122_s17 + $0x10] sm:$0xff] %v968_v4  ;;  %v1024_v23 = vsel %vm1022_vm15, %v1023_v57, %v1021_v19  ;;  %v986_v50 = vsel %vm985_vm0, %v2486_v58, %v984_v16  ;;  %vm1041_vm2 = vcmp.eq.f32.partialorder %v2500_v60, inf  ;;  %v1044_v59 = vand.u32 2147483648, %v2500_v60  ;;  %v1635_v7 = vpop.eup %1634 }
 0x2b8   : > { %1070 = vst [vmem:[%s2122_s17 + $0x50] sm:$0xff] %v1024_v23  ;;  %v989_v27 = vsel %vm987_vm1, %v988_v20, %v986_v50  ;;  %1638 = vrsqrt.f32 %v2567_v6  ;;  %v1042_v52 = vsel %vm1041_vm2, %v2500_v60, %v1040_v5  ;;  %vm1043_vm3 = vcmp.eq.f32.partialorder %v2500_v60, 0.0 }
 0x2b9   : > { %1065 = vst [vmem:[%s2122_s17 + $0x28] sm:$0xff] %v989_v27  ;;  %v977_v58 = vmul.f32 %v1633_v53, %v2509_v35  ;;  %1640 = vrsqrt.f32 %v2575_v9  ;;  %v1045_v26 = vsel %vm1043_vm3, %v1044_v59, %v1042_v52  ;;  %vm978_vm4 = vcmp.eq.f32.partialorder %v2509_v35, inf }
 0x2ba   : > { %v981_v28 = vand.u32 2147483648, %v2509_v35  ;;  %1073 = vst [vmem:[%s2122_s17 + $0x68] sm:$0xff] %v1045_v26  ;;  %vm980_vm5 = vcmp.eq.f32.partialorder %v2509_v35, 0.0  ;;  %v1033_v30 = vmul.f32 %v1635_v7, %v2516_v37  ;;  %v946_v18 = vmax.f32 %v930_v51, 0.0 }
 0x2bb   : > { %v979_v8 = vsel %vm978_vm4, %v2509_v35, %v977_v58  ;;  %vm1034_vm6 = vcmp.eq.f32.partialorder %v2516_v37, inf  ;;  %v1037_v60 = vand.u32 2147483648, %v2516_v37  ;;  %vm1036_vm7 = vcmp.eq.f32.partialorder %v2516_v37, 0.0 }
 0x2bc   : > { %v982_v62 = vsel %vm980_vm5, %v981_v28, %v979_v8  ;;  %v1035_v31 = vsel %vm1034_vm6, %v2516_v37, %v1033_v30  ;;  %1642 = vrsqrt.f32 %v946_v18  ;;  %vm999_vm8 = vcmp.eq.f32.partialorder %v939_v54, inf }
 0x2bd   : > { %1064 = vst [vmem:[%s2122_s17 + $0x20] sm:$0xff] %v982_v62  ;;  %v1038_v39 = vsel %vm1036_vm7, %v1037_v60, %v1035_v31  ;;  %v1002_v32 = vand.u32 2147483648, %v939_v54  ;;  %vm1001_vm9 = vcmp.eq.f32.partialorder %v939_v54, 0.0  ;;  %vm1055_vm10 = vcmp.eq.f32.partialorder %v2567_v6, inf }
 0x2be   : > { %v1637_v61 = vpop.eup %1636  ;;  %1072 = vst [vmem:[%s2122_s17 + $0x60] sm:$0xff] %v1038_v39  ;;  %v1058_v37 = vand.u32 2147483648, %v2567_v6  ;;  %vm1057_vm11 = vcmp.eq.f32.partialorder %v2567_v6, 0.0  ;;  %vm992_vm12 = vcmp.eq.f32.partialorder %v2575_v9, inf  ;;  %v995_v24 = vand.u32 2147483648, %v2575_v9 }
 0x2bf   : > { %v998_v25 = vmul.f32 %v1637_v61, %v939_v54  ;;  %vm994_vm13 = vcmp.eq.f32.partialorder %v2575_v9, 0.0  ;;  %vm1048_vm14 = vcmp.eq.f32.partialorder %v946_v18, inf  ;;  %v1051_v44 = vand.u32 2147483648, %v946_v18 }
 0x2c0   : > { %vm1050_vm15 = vcmp.eq.f32.partialorder %v946_v18, 0.0 }
 0x2c1   : > { %v1000_v36 = vsel %vm999_vm8, %v939_v54, %v998_v25 }
 0x2c2   : > { %v1639_v35 = vpop.eup %1638  ;;  %v1003_v12 = vsel %vm1001_vm9, %v1002_v32, %v1000_v36 }
 0x2c3   : > { %v1641_v21 = vpop.eup %1640  ;;  %v1054_v49 = vmul.f32 %v1639_v35, %v2567_v6  ;;  %1067 = vst [vmem:[%s2122_s17 + $0x38] sm:$0xff] %v1003_v12 }
 0x2c4   : > { %v991_v3 = vmul.f32 %v1641_v21, %v2575_v9 }
 0x2c5   : > { %v1056_v11 = vsel %vm1055_vm10, %v2567_v6, %v1054_v49 }
 0x2c6   : > { %v1059_v33 = vsel %vm1057_vm11, %v1058_v37, %v1056_v11  ;;  %v993_v48 = vsel %vm992_vm12, %v2575_v9, %v991_v3  ;;  %v1643_v63 = vpop.eup %1642 }
 0x2c7   : > { %1075 = vst [vmem:[%s2122_s17 + $0x78] sm:$0xff] %v1059_v33  ;;  %v996_v55 = vsel %vm994_vm13, %v995_v24, %v993_v48  ;;  %v1047_v38 = vmul.f32 %v1643_v63, %v946_v18 }
 0x2c8   : > { %1066 = vst [vmem:[%s2122_s17 + $0x30] sm:$0xff] %v996_v55 }
 0x2c9   : > { %v1049_v56 = vsel %vm1048_vm14, %v946_v18, %v1047_v38 }
 0x2ca   : > { %v1052_v29 = vsel %vm1050_vm15, %v1051_v44, %v1049_v56 }
 0x2cb   : > { %1074 = vst [vmem:[%s2122_s17 + $0x70] sm:$0xff] %v1052_v29 }
 0x2cc PF: > { %1082 = sbr.rel (!%p1779_p5) target bundleno = 728 (0x2d8), region = 60  ;;  %s1249_s12 = sshll.u32 (%p1779_p5), %s1686_s23, 5  ;;  %v1145_v22 = vld [vmem:[%s2122_s17] sm:$0xff] (%p1779_p5)  ;;  %v1147_v2 = vld [vmem:[%s2122_s17 + $0x8] sm:$0xff] (%p1779_p5)  ;;  %v1149_v45 = vld [vmem:[%s2122_s17 + $0x10] sm:$0xff] (%p1779_p5) }
 0x2cd   : > { %s1085_s30 = sadd.s32 (%p1779_p5), %s1682_s22, %s1249_s12  ;;  %v1151_v13 = vld [vmem:[%s2122_s17 + $0x18] sm:$0xff] (%p1779_p5)  ;;  %v1153_v15 = vld [vmem:[%s2122_s17 + $0x20] sm:$0xff] (%p1779_p5)  ;;  %v1155_v34 = vld [vmem:[%s2122_s17 + $0x28] sm:$0xff] (%p1779_p5) }
 0x2ce   : > { %s1246_s13 = sshll.u32 (%p1779_p5), %s1085_s30, 3  ;;  %v1159_v57 = vld [vmem:[%s2122_s17 + $0x38] sm:$0xff] (%p1779_p5)  ;;  %v1161_v41 = vld [vmem:[%s2122_s17 + $0x40] sm:$0xff] (%p1779_p5)  ;;  %v1163_v0 = vld [vmem:[%s2122_s17 + $0x48] sm:$0xff] (%p1779_p5) }
 0x2cf   : > { %v1157_v40 = vld [vmem:[%s2122_s17 + $0x30] sm:$0xff] (%p1779_p5)  ;;  %s1087_s16 = scalar_lea.vmem (%p1779_p5), %s2685_s5, %s1246_s13  ;;  %v1167_v54 = vld [vmem:[%s2122_s17 + $0x58] sm:$0xff] (%p1779_p5)  ;;  %v1169_v6 = vld [vmem:[%s2122_s17 + $0x60] sm:$0xff] (%p1779_p5) }
 0x2d0   : > { %v1165_v1 = vld [vmem:[%s2122_s17 + $0x50] sm:$0xff] (%p1779_p5)  ;;  %1146 = vst [vmem:[%s1087_s16] sm:$0xff] (%p1779_p5), %v1145_v22  ;;  %1148 = vst [vmem:[%s1087_s16 + $0x10] sm:$0xff] (%p1779_p5), %v1147_v2  ;;  %v1171_v42 = vld [vmem:[%s2122_s17 + $0x68] sm:$0xff] (%p1779_p5) }
 0x2d1   : > { %1150 = vst [vmem:[%s1087_s16 + $0x20] sm:$0xff] (%p1779_p5), %v1149_v45  ;;  %1152 = vst [vmem:[%s1087_s16 + $0x30] sm:$0xff] (%p1779_p5), %v1151_v13  ;;  %v1175_v46 = vld [vmem:[%s2122_s17 + $0x78] sm:$0xff] (%p1779_p5) }
 0x2d2   : > { %1154 = vst [vmem:[%s1087_s16 + $0x40] sm:$0xff] (%p1779_p5), %v1153_v15  ;;  %1156 = vst [vmem:[%s1087_s16 + $0x50] sm:$0xff] (%p1779_p5), %v1155_v34  ;;  %v1173_v43 = vld [vmem:[%s2122_s17 + $0x70] sm:$0xff] (%p1779_p5) }
 0x2d3   : > { %1158 = vst [vmem:[%s1087_s16 + $0x60] sm:$0xff] %v1157_v40  ;;  %1160 = vst [vmem:[%s1087_s16 + $0x70] sm:$0xff] %v1159_v57 }
 0x2d4   : > { %1162 = vst [vmem:[%s1087_s16 + $0x80] sm:$0xff] %v1161_v41  ;;  %1164 = vst [vmem:[%s1087_s16 + $0x90] sm:$0xff] %v1163_v0 }
 0x2d5   : > { %1166 = vst [vmem:[%s1087_s16 + $0xa0] sm:$0xff] %v1165_v1  ;;  %1168 = vst [vmem:[%s1087_s16 + $0xb0] sm:$0xff] %v1167_v54 }
 0x2d6   : > { %1170 = vst [vmem:[%s1087_s16 + $0xc0] sm:$0xff] %v1169_v6  ;;  %1172 = vst [vmem:[%s1087_s16 + $0xd0] sm:$0xff] %v1171_v42 }
 0x2d7   : > { %1174 = vst [vmem:[%s1087_s16 + $0xe0] sm:$0xff] %v1173_v43  ;;  %1176 = vst [vmem:[%s1087_s16 + $0xf0] sm:$0xff] %v1175_v46 }
 0x2d8 PF: > { %s17_s26 = sadd.s32 1, %s1698_s26   ;;  %s2688_s20 = smov %s1678_s21 }
 0x2d9   : > { %p14_p3 = scmp.ge.s32.totalorder %s17_s26, 6   ;;  %s2689_s21 = smov %s1790_s9 }
 0x2da   : > { %s2690_s22 = smov %s1690_s24  ;;  %s2691_s23 = smov %s1694_s25 }
 0x2db   : > { %s2692_s24 = smov %s2695_s0  ;;  %s2693_s25 = smov %s2699_s27 }
 0x2dc   :  { %16 = sbr.rel (!%p14_p3) target bundleno = 7 (0x7), region = 121 }

</bundles_post_ra>
